<compile_context>
chip_gen: v5e
topology: v5e:2x2
jax: 0.10.0
libtpu: 0.0.40
codegen_flags: <defaults>
</compile_context>

<pallas_src>
import math

import jax
import jax.numpy as jnp
from jax import lax
from jax.experimental import pallas as pl
from jax.experimental.pallas import tpu as pltpu

# ---------------- model hyperparameters (small, consistent with the module) -------------
BATCH       = 2
PATCH_SIZE  = 8            # -> input sequence length
EMBED_DIM   = 32
NUM_HEADS   = 4
HEAD_DIM    = EMBED_DIM // NUM_HEADS
MLP_SIZE    = 64
NUM_LAYERS  = 2
NUM_CLASSES = 1
SEQ_LEN     = PATCH_SIZE + 1   # class token prepended
LN_EPS      = 1e-5
_INV_SQRT2  = 1.0 / math.sqrt(2.0)
_ATTN_SCALE = 1.0 / math.sqrt(HEAD_DIM)


def _layer_norm(x, w, b):
    mu = jnp.mean(x, axis=-1, keepdims=True)
    var = jnp.mean((x - mu) ** 2, axis=-1, keepdims=True)
    return (x - mu) * lax.rsqrt(var + LN_EPS) * w + b


def _gelu_exact(x):
    return 0.5 * x * (1.0 + lax.erf(x * _INV_SQRT2))


# ---------------------------- fused Pallas kernel ----------------------------------------
def vit_kernel(x_ref, cls_ref, pos_ref,
               ln1w_ref, ln1b_ref, wqkv_ref, bqkv_ref, wo_ref, bo_ref,
               ln2w_ref, ln2b_ref, w1_ref, b1_ref, w2_ref, b2_ref,
               clnw_ref, clnb_ref, wc_ref, bc_ref,
               o_ref):
    """Entire ViT forward for one batch element.

    x_ref: (PATCH_SIZE, D).  All per-layer weight refs carry a leading layer axis
    and Linear weights are already (in_features, out_features).
    """
    # --- embedding: prepend class token, add position embedding (fused, no XLA glue) ---
    x = jnp.concatenate([cls_ref[...], x_ref[...]], axis=0) + pos_ref[...]   # (T, D)
    # embedding_dropout / attn_dropout / mlp_dropout: identity in eval mode

    # --- transformer encoder: static loop over layers, everything stays in VMEM ---
    for l in range(NUM_LAYERS):
        # ---- MultiheadSelfAttentionBlock + residual ----
        xn = _layer_norm(x, ln1w_ref[l], ln1b_ref[l])
        qkv = jnp.dot(xn, wqkv_ref[l],
                      preferred_element_type=jnp.float32) + bqkv_ref[l]      # (T, 3D)
        q = qkv[:, 0 * EMBED_DIM:1 * EMBED_DIM]
        k = qkv[:, 1 * EMBED_DIM:2 * EMBED_DIM]
        v = qkv[:, 2 * EMBED_DIM:3 * EMBED_DIM]

        # all heads in one batched matmul (leading head axis, no per-head matmul loop)
        def split_heads(m):                                                  # (T,D)->(H,T,hd)
            return jnp.stack(
                [m[:, h * HEAD_DIM:(h + 1) * HEAD_DIM] for h in range(NUM_HEADS)],
                axis=0)

        qh, kh, vh = split_heads(q), split_heads(k), split_heads(v)
        s = jnp.einsum('hqd,hkd->hqk', qh, kh,
                       preferred_element_type=jnp.float32) * _ATTN_SCALE      # (H, T, T)
        s = s - jnp.max(s, axis=-1, keepdims=True)
        p = jnp.exp(s)
        p = p * pl.reciprocal(jnp.sum(p, axis=-1, keepdims=True), approx=True)
        oh = jnp.einsum('hqk,hkd->hqd', p, vh,
                        preferred_element_type=jnp.float32)                   # (H, T, hd)
        attn = jnp.concatenate([oh[h] for h in range(NUM_HEADS)], axis=-1)    # (T, D)
        attn = jnp.dot(attn, wo_ref[l],
                       preferred_element_type=jnp.float32) + bo_ref[l]
        x = attn + x                                                          # residual 1

        # ---- MLPBlock + residual ----
        xn = _layer_norm(x, ln2w_ref[l], ln2b_ref[l])
        h1 = jnp.dot(xn, w1_ref[l], preferred_element_type=jnp.float32) + b1_ref[l]
        h1 = _gelu_exact(h1)
        h2 = jnp.dot(h1, w2_ref[l], preferred_element_type=jnp.float32) + b2_ref[l]
        x = h2 + x                                                            # residual 2

    # --- classifier head on the class token ---
    x0 = x[0:1, :]                                                            # (1, D)
    xn = _layer_norm(x0, clnw_ref[...], clnb_ref[...])
    o_ref[...] = (jnp.dot(xn, wc_ref[...], preferred_element_type=jnp.float32)
                  + bc_ref[...]).astype(o_ref.dtype)                          # (1, C)


# ---------------------------- wrapper -----------------------------------------------------
def _full_spec(arr):
    nd = arr.ndim
    return pl.BlockSpec(arr.shape, lambda b, _nd=nd: (0,) * _nd)


def vit_forward(x, packed):
    """x: (B, PATCH_SIZE, EMBED_DIM) float32 -> (B, NUM_CLASSES)."""
    B = x.shape[0]
    weights = (packed["cls"], packed["pos"],
               packed["ln1_w"], packed["ln1_b"], packed["w_qkv"], packed["b_qkv"],
               packed["w_o"], packed["b_o"],
               packed["ln2_w"], packed["ln2_b"], packed["w_mlp1"], packed["b_mlp1"],
               packed["w_mlp2"], packed["b_mlp2"],
               packed["cls_ln_w"], packed["cls_ln_b"], packed["w_c"], packed["b_c"])

    x_spec = pl.BlockSpec((pl.Squeezed(), PATCH_SIZE, EMBED_DIM), lambda b: (b, 0, 0))
    in_specs = [x_spec] + [_full_spec(w) for w in weights]
    # 3-D output so the last two block dims equal the full array dims (tiny masked store).
    out_spec = pl.BlockSpec((pl.Squeezed(), 1, NUM_CLASSES), lambda b: (b, 0, 0))

    # rough cost hint so XLA schedules the custom call sensibly
    per_layer_macs = (SEQ_LEN * EMBED_DIM * 3 * EMBED_DIM
                      + 2 * NUM_HEADS * SEQ_LEN * SEQ_LEN * HEAD_DIM
                      + SEQ_LEN * EMBED_DIM * EMBED_DIM
                      + 2 * SEQ_LEN * EMBED_DIM * MLP_SIZE)
    flops = 2 * B * (NUM_LAYERS * per_layer_macs + EMBED_DIM * NUM_CLASSES)
    transcendentals = B * NUM_LAYERS * (NUM_HEADS * SEQ_LEN * SEQ_LEN + SEQ_LEN * MLP_SIZE)
    bytes_accessed = (sum(int(w.size) * w.dtype.itemsize for w in weights)
                      + int(x.size) * x.dtype.itemsize + B * NUM_CLASSES * 4)

    out = pl.pallas_call(
        vit_kernel,
        out_shape=jax.ShapeDtypeStruct((B, 1, NUM_CLASSES), jnp.float32),
        grid=(B,),
        in_specs=in_specs,
        out_specs=out_spec,
        compiler_params=pltpu.CompilerParams(dimension_semantics=("parallel",)),
        cost_estimate=pl.CostEstimate(flops=flops,
                                      transcendentals=transcendentals,
                                      bytes_accessed=bytes_accessed),
    )(x, *weights)
    return out.reshape(B, NUM_CLASSES)


# ---------------------------- parameters --------------------------------------------------
def init_params(key):
    """PyTorch-layout parameters (Linear weights are (out_features, in_features))."""
    def nrm(k, shape, scale=0.05):
        return jax.random.normal(k, shape, dtype=jnp.float32) * scale

    keys = jax.random.split(key, 3 + NUM_LAYERS)
    params = {
        "class_embedding":    nrm(keys[0], (1, 1, EMBED_DIM), 1.0),
        "position_embedding": nrm(keys[1], (1, SEQ_LEN, EMBED_DIM), 1.0),
        "layers": [],
    }
    for l in range(NUM_LAYERS):
        lk = jax.random.split(keys[2 + l], 8)
        params["layers"].append({
            "ln1_w":  jnp.ones((EMBED_DIM,), jnp.float32),
            "ln1_b":  jnp.zeros((EMBED_DIM,), jnp.float32),
            "w_qkv":  nrm(lk[0], (3 * EMBED_DIM, EMBED_DIM)),
            "b_qkv":  nrm(lk[1], (3 * EMBED_DIM,)),
            "w_o":    nrm(lk[2], (EMBED_DIM, EMBED_DIM)),
            "b_o":    nrm(lk[3], (EMBED_DIM,)),
            "ln2_w":  jnp.ones((EMBED_DIM,), jnp.float32),
            "ln2_b":  jnp.zeros((EMBED_DIM,), jnp.float32),
            "w_mlp1": nrm(lk[4], (MLP_SIZE, EMBED_DIM)),
            "b_mlp1": nrm(lk[5], (MLP_SIZE,)),
            "w_mlp2": nrm(lk[6], (EMBED_DIM, MLP_SIZE)),
            "b_mlp2": nrm(lk[7], (EMBED_DIM,)),
        })
    ck = jax.random.split(keys[2 + NUM_LAYERS], 2)
    params["classifier"] = {
        "ln_w": jnp.ones((EMBED_DIM,), jnp.float32),
        "ln_b": jnp.zeros((EMBED_DIM,), jnp.float32),
        "w_c":  nrm(ck[0], (NUM_CLASSES, EMBED_DIM)),
        "b_c":  nrm(ck[1], (NUM_CLASSES,)),
    }
    return params


def pack_params(params):
    """One-time host-side packing: stack per-layer weights along a leading layer axis and
    pre-transpose every Linear weight to (in_features, out_features) so kernels do x @ W."""
    layers = params["layers"]

    def stack_mat(name):   # PyTorch (out,in) -> stacked (L, in, out)
        return jnp.stack([p[name].T for p in layers], axis=0)

    def stack_vec(name):   # (F,) -> (L, 1, F) so it broadcasts against (T, F)
        return jnp.stack([p[name] for p in layers], axis=0)[:, None, :]

    cl = params["classifier"]
    return {
        "cls": params["class_embedding"].reshape(1, EMBED_DIM),
        "pos": params["position_embedding"].reshape(SEQ_LEN, EMBED_DIM),
        "ln1_w": stack_vec("ln1_w"),   "ln1_b": stack_vec("ln1_b"),
        "w_qkv": stack_mat("w_qkv"),   "b_qkv": stack_vec("b_qkv"),
        "w_o":   stack_mat("w_o"),     "b_o":   stack_vec("b_o"),
        "ln2_w": stack_vec("ln2_w"),   "ln2_b": stack_vec("ln2_b"),
        "w_mlp1": stack_mat("w_mlp1"), "b_mlp1": stack_vec("b_mlp1"),
        "w_mlp2": stack_mat("w_mlp2"), "b_mlp2": stack_vec("b_mlp2"),
        "cls_ln_w": cl["ln_w"].reshape(1, EMBED_DIM),
        "cls_ln_b": cl["ln_b"].reshape(1, EMBED_DIM),
        "w_c": cl["w_c"].T,                       # (D, C)
        "b_c": cl["b_c"].reshape(1, NUM_CLASSES),
    }


# ---------------------------- main --------------------------------------------------------
if __name__ == "__main__":
    key = jax.random.PRNGKey(0)
    pkey, xkey = jax.random.split(key)

    params = init_params(pkey)
    packed = pack_params(params)
    # input "x" as the PyTorch forward expects: (batch, patch_size, embedding_dim)
    x = jax.random.normal(xkey, (BATCH, PATCH_SIZE, EMBED_DIM), dtype=jnp.float32)

    out = jax.block_until_ready(vit_forward(x, packed))
    assert out.shape == (BATCH, NUM_CLASSES)
    assert jnp.all(jnp.isfinite(out))
    print("KERNEL_OK")
</pallas_src>

<mosaic_0001>
module attributes {stable_mosaic.version = 11 : i64} {
  func.func @vit_kernel(%arg0: i32, %arg1: memref<1x8x32xf32, #tpu.memory_space<vmem>>, %arg2: memref<1x32xf32, #tpu.memory_space<vmem>>, %arg3: memref<9x32xf32, #tpu.memory_space<vmem>>, %arg4: memref<2x1x32xf32, #tpu.memory_space<vmem>>, %arg5: memref<2x1x32xf32, #tpu.memory_space<vmem>>, %arg6: memref<2x32x96xf32, #tpu.memory_space<vmem>>, %arg7: memref<2x1x96xf32, #tpu.memory_space<vmem>>, %arg8: memref<2x32x32xf32, #tpu.memory_space<vmem>>, %arg9: memref<2x1x32xf32, #tpu.memory_space<vmem>>, %arg10: memref<2x1x32xf32, #tpu.memory_space<vmem>>, %arg11: memref<2x1x32xf32, #tpu.memory_space<vmem>>, %arg12: memref<2x32x64xf32, #tpu.memory_space<vmem>>, %arg13: memref<2x1x64xf32, #tpu.memory_space<vmem>>, %arg14: memref<2x64x32xf32, #tpu.memory_space<vmem>>, %arg15: memref<2x1x32xf32, #tpu.memory_space<vmem>>, %arg16: memref<1x32xf32, #tpu.memory_space<vmem>>, %arg17: memref<1x32xf32, #tpu.memory_space<vmem>>, %arg18: memref<32x1xf32, #tpu.memory_space<vmem>>, %arg19: memref<1x1xf32, #tpu.memory_space<vmem>>, %arg20: memref<1x1x1xf32, #tpu.memory_space<vmem>>) attributes {dimension_semantics = [#tpu.dimension_semantics<parallel>], iteration_bounds = array<i64: 2>, scalar_prefetch = 0 : i64, scratch_operands = 0 : i64, tpu.core_type = #tpu.core_type<tc>, window_params = [{transform_indices = @transform_0, window_bounds = array<i64: 1, 8, 32>}, {pipeline_mode = #tpu.pipeline_mode<synchronous>, transform_indices = @transform_1, window_bounds = array<i64: 1, 32>}, {pipeline_mode = #tpu.pipeline_mode<synchronous>, transform_indices = @transform_2, window_bounds = array<i64: 9, 32>}, {pipeline_mode = #tpu.pipeline_mode<synchronous>, transform_indices = @transform_3, window_bounds = array<i64: 2, 1, 32>}, {pipeline_mode = #tpu.pipeline_mode<synchronous>, transform_indices = @transform_4, window_bounds = array<i64: 2, 1, 32>}, {pipeline_mode = #tpu.pipeline_mode<synchronous>, transform_indices = @transform_5, window_bounds = array<i64: 2, 32, 96>}, {pipeline_mode = #tpu.pipeline_mode<synchronous>, transform_indices = @transform_6, window_bounds = array<i64: 2, 1, 96>}, {pipeline_mode = #tpu.pipeline_mode<synchronous>, transform_indices = @transform_7, window_bounds = array<i64: 2, 32, 32>}, {pipeline_mode = #tpu.pipeline_mode<synchronous>, transform_indices = @transform_8, window_bounds = array<i64: 2, 1, 32>}, {pipeline_mode = #tpu.pipeline_mode<synchronous>, transform_indices = @transform_9, window_bounds = array<i64: 2, 1, 32>}, {pipeline_mode = #tpu.pipeline_mode<synchronous>, transform_indices = @transform_10, window_bounds = array<i64: 2, 1, 32>}, {pipeline_mode = #tpu.pipeline_mode<synchronous>, transform_indices = @transform_11, window_bounds = array<i64: 2, 32, 64>}, {pipeline_mode = #tpu.pipeline_mode<synchronous>, transform_indices = @transform_12, window_bounds = array<i64: 2, 1, 64>}, {pipeline_mode = #tpu.pipeline_mode<synchronous>, transform_indices = @transform_13, window_bounds = array<i64: 2, 64, 32>}, {pipeline_mode = #tpu.pipeline_mode<synchronous>, transform_indices = @transform_14, window_bounds = array<i64: 2, 1, 32>}, {pipeline_mode = #tpu.pipeline_mode<synchronous>, transform_indices = @transform_15, window_bounds = array<i64: 1, 32>}, {pipeline_mode = #tpu.pipeline_mode<synchronous>, transform_indices = @transform_16, window_bounds = array<i64: 1, 32>}, {pipeline_mode = #tpu.pipeline_mode<synchronous>, transform_indices = @transform_17, window_bounds = array<i64: 32, 1>}, {pipeline_mode = #tpu.pipeline_mode<synchronous>, transform_indices = @transform_18, window_bounds = array<i64: 1, 1>}, {transform_indices = @transform_19, window_bounds = array<i64: 1, 1, 1>}]} {
    %c0 = arith.constant 0 : index
    %c0_0 = arith.constant 0 : index
    %0 = vector.load %arg2[%c0, %c0_0] : memref<1x32xf32, #tpu.memory_space<vmem>>, vector<1x32xf32>
    %c0_1 = arith.constant 0 : index
    %c0_2 = arith.constant 0 : index
    %c0_3 = arith.constant 0 : index
    %1 = vector.load %arg1[%c0_1, %c0_2, %c0_3] : memref<1x8x32xf32, #tpu.memory_space<vmem>>, vector<1x8x32xf32>
    %2 = vector.shape_cast %1 : vector<1x8x32xf32> to vector<8x32xf32>
    %3 = tpu.concatenate %0, %2 in 0 : vector<1x32xf32>, vector<8x32xf32> -> vector<9x32xf32>
    %c0_4 = arith.constant 0 : index
    %c0_5 = arith.constant 0 : index
    %4 = vector.load %arg3[%c0_4, %c0_5] : memref<9x32xf32, #tpu.memory_space<vmem>>, vector<9x32xf32>
    %5 = arith.addf %3, %4 : vector<9x32xf32>
    %c0_6 = arith.constant 0 : index
    %c0_7 = arith.constant 0 : index
    %c0_8 = arith.constant 0 : index
    %6 = vector.load %arg4[%c0_6, %c0_7, %c0_8] : memref<2x1x32xf32, #tpu.memory_space<vmem>>, vector<1x1x32xf32>
    %7 = vector.shape_cast %6 : vector<1x1x32xf32> to vector<1x32xf32>
    %c0_9 = arith.constant 0 : index
    %c0_10 = arith.constant 0 : index
    %c0_11 = arith.constant 0 : index
    %8 = vector.load %arg5[%c0_9, %c0_10, %c0_11] : memref<2x1x32xf32, #tpu.memory_space<vmem>>, vector<1x1x32xf32>
    %9 = vector.shape_cast %8 : vector<1x1x32xf32> to vector<1x32xf32>
    %cst = arith.constant dense<0.000000e+00> : vector<9xf32>
    %10 = vector.multi_reduction <add>, %5, %cst [1] : vector<9x32xf32> to vector<9xf32>
    %11 = vector.shape_cast %10 : vector<9xf32> to vector<9x1xf32>
    %cst_12 = arith.constant 3.200000e+01 : f32
    %12 = vector.broadcast %cst_12 : f32 to vector<9x1xf32>
    %13 = arith.divf %11, %12 : vector<9x1xf32>
    %14 = vector.broadcast %13 : vector<9x1xf32> to vector<9x32xf32>
    %15 = arith.subf %5, %14 : vector<9x32xf32>
    %16 = arith.mulf %15, %15 : vector<9x32xf32>
    %cst_13 = arith.constant dense<0.000000e+00> : vector<9xf32>
    %17 = vector.multi_reduction <add>, %16, %cst_13 [1] : vector<9x32xf32> to vector<9xf32>
    %18 = vector.shape_cast %17 : vector<9xf32> to vector<9x1xf32>
    %cst_14 = arith.constant 3.200000e+01 : f32
    %19 = vector.broadcast %cst_14 : f32 to vector<9x1xf32>
    %20 = arith.divf %18, %19 : vector<9x1xf32>
    %21 = vector.broadcast %13 : vector<9x1xf32> to vector<9x32xf32>
    %22 = arith.subf %5, %21 : vector<9x32xf32>
    %cst_15 = arith.constant 9.99999974E-6 : f32
    %23 = vector.broadcast %cst_15 : f32 to vector<9x1xf32>
    %24 = arith.addf %20, %23 : vector<9x1xf32>
    %25 = math.rsqrt %24 : vector<9x1xf32>
    %26 = vector.broadcast %25 : vector<9x1xf32> to vector<9x32xf32>
    %27 = arith.mulf %22, %26 : vector<9x32xf32>
    %28 = vector.broadcast %7 : vector<1x32xf32> to vector<9x32xf32>
    %29 = arith.mulf %27, %28 : vector<9x32xf32>
    %30 = vector.broadcast %9 : vector<1x32xf32> to vector<9x32xf32>
    %31 = arith.addf %29, %30 : vector<9x32xf32>
    %c0_16 = arith.constant 0 : index
    %c0_17 = arith.constant 0 : index
    %c0_18 = arith.constant 0 : index
    %32 = vector.load %arg6[%c0_16, %c0_17, %c0_18] : memref<2x32x96xf32, #tpu.memory_space<vmem>>, vector<1x32x96xf32>
    %33 = vector.shape_cast %32 : vector<1x32x96xf32> to vector<32x96xf32>
    %cst_19 = arith.constant dense<0.000000e+00> : vector<9x96xf32>
    %34 = tpu.matmul %31, %33, %cst_19 {dimension_numbers = #tpu.dot_dimension_numbers<[1], [0], [0], [1], [0, 0, 1, 1], [], []>} : vector<9x32xf32>, vector<32x96xf32>, vector<9x96xf32> -> vector<9x96xf32>
    %c0_20 = arith.constant 0 : index
    %c0_21 = arith.constant 0 : index
    %c0_22 = arith.constant 0 : index
    %35 = vector.load %arg7[%c0_20, %c0_21, %c0_22] : memref<2x1x96xf32, #tpu.memory_space<vmem>>, vector<1x1x96xf32>
    %36 = vector.shape_cast %35 : vector<1x1x96xf32> to vector<1x96xf32>
    %37 = vector.broadcast %36 : vector<1x96xf32> to vector<9x96xf32>
    %38 = arith.addf %34, %37 : vector<9x96xf32>
    %39 = vector.extract_strided_slice %38 {offsets = [0, 0], sizes = [9, 32], strides = [1, 1]} : vector<9x96xf32> to vector<9x32xf32>
    %40 = vector.extract_strided_slice %38 {offsets = [0, 32], sizes = [9, 32], strides = [1, 1]} : vector<9x96xf32> to vector<9x32xf32>
    %41 = vector.extract_strided_slice %38 {offsets = [0, 64], sizes = [9, 32], strides = [1, 1]} : vector<9x96xf32> to vector<9x32xf32>
    %42 = vector.extract_strided_slice %39 {offsets = [0, 0], sizes = [9, 8], strides = [1, 1]} : vector<9x32xf32> to vector<9x8xf32>
    %43 = vector.extract_strided_slice %39 {offsets = [0, 8], sizes = [9, 8], strides = [1, 1]} : vector<9x32xf32> to vector<9x8xf32>
    %44 = vector.extract_strided_slice %39 {offsets = [0, 16], sizes = [9, 8], strides = [1, 1]} : vector<9x32xf32> to vector<9x8xf32>
    %45 = vector.extract_strided_slice %39 {offsets = [0, 24], sizes = [9, 8], strides = [1, 1]} : vector<9x32xf32> to vector<9x8xf32>
    %46 = vector.shape_cast %42 : vector<9x8xf32> to vector<1x9x8xf32>
    %47 = vector.shape_cast %43 : vector<9x8xf32> to vector<1x9x8xf32>
    %48 = vector.shape_cast %44 : vector<9x8xf32> to vector<1x9x8xf32>
    %49 = vector.shape_cast %45 : vector<9x8xf32> to vector<1x9x8xf32>
    %50 = tpu.concatenate %46, %47, %48, %49 in 0 : vector<1x9x8xf32>, vector<1x9x8xf32>, vector<1x9x8xf32>, vector<1x9x8xf32> -> vector<4x9x8xf32>
    %51 = vector.extract_strided_slice %40 {offsets = [0, 0], sizes = [9, 8], strides = [1, 1]} : vector<9x32xf32> to vector<9x8xf32>
    %52 = vector.extract_strided_slice %40 {offsets = [0, 8], sizes = [9, 8], strides = [1, 1]} : vector<9x32xf32> to vector<9x8xf32>
    %53 = vector.extract_strided_slice %40 {offsets = [0, 16], sizes = [9, 8], strides = [1, 1]} : vector<9x32xf32> to vector<9x8xf32>
    %54 = vector.extract_strided_slice %40 {offsets = [0, 24], sizes = [9, 8], strides = [1, 1]} : vector<9x32xf32> to vector<9x8xf32>
    %55 = vector.shape_cast %51 : vector<9x8xf32> to vector<1x9x8xf32>
    %56 = vector.shape_cast %52 : vector<9x8xf32> to vector<1x9x8xf32>
    %57 = vector.shape_cast %53 : vector<9x8xf32> to vector<1x9x8xf32>
    %58 = vector.shape_cast %54 : vector<9x8xf32> to vector<1x9x8xf32>
    %59 = tpu.concatenate %55, %56, %57, %58 in 0 : vector<1x9x8xf32>, vector<1x9x8xf32>, vector<1x9x8xf32>, vector<1x9x8xf32> -> vector<4x9x8xf32>
    %60 = vector.extract_strided_slice %41 {offsets = [0, 0], sizes = [9, 8], strides = [1, 1]} : vector<9x32xf32> to vector<9x8xf32>
    %61 = vector.extract_strided_slice %41 {offsets = [0, 8], sizes = [9, 8], strides = [1, 1]} : vector<9x32xf32> to vector<9x8xf32>
    %62 = vector.extract_strided_slice %41 {offsets = [0, 16], sizes = [9, 8], strides = [1, 1]} : vector<9x32xf32> to vector<9x8xf32>
    %63 = vector.extract_strided_slice %41 {offsets = [0, 24], sizes = [9, 8], strides = [1, 1]} : vector<9x32xf32> to vector<9x8xf32>
    %64 = vector.shape_cast %60 : vector<9x8xf32> to vector<1x9x8xf32>
    %65 = vector.shape_cast %61 : vector<9x8xf32> to vector<1x9x8xf32>
    %66 = vector.shape_cast %62 : vector<9x8xf32> to vector<1x9x8xf32>
    %67 = vector.shape_cast %63 : vector<9x8xf32> to vector<1x9x8xf32>
    %68 = tpu.concatenate %64, %65, %66, %67 in 0 : vector<1x9x8xf32>, vector<1x9x8xf32>, vector<1x9x8xf32>, vector<1x9x8xf32> -> vector<4x9x8xf32>
    "tpu.trace_start"() <{level = 10 : i32, message = "hqd,hkd->hqk"}> : () -> ()
    %cst_23 = arith.constant dense<0.000000e+00> : vector<4x9x9xf32>
    %69 = tpu.matmul %50, %59, %cst_23 {dimension_numbers = #tpu.dot_dimension_numbers<[2], [2], [1], [1], [0, 0, 0, 1, 1, 1], [0], [0]>} : vector<4x9x8xf32>, vector<4x9x8xf32>, vector<4x9x9xf32> -> vector<4x9x9xf32>
    "tpu.trace_stop"() : () -> ()
    %cst_24 = arith.constant 0.353553385 : f32
    %70 = vector.broadcast %cst_24 : f32 to vector<4x9x9xf32>
    %71 = arith.mulf %69, %70 : vector<4x9x9xf32>
    %cst_25 = arith.constant dense<0xFF800000> : vector<4x9xf32>
    %72 = vector.multi_reduction <maximumf>, %71, %cst_25 [2] : vector<4x9x9xf32> to vector<4x9xf32>
    %73 = vector.shape_cast %72 : vector<4x9xf32> to vector<4x9x1xf32>
    %74 = vector.broadcast %73 : vector<4x9x1xf32> to vector<4x9x9xf32>
    %75 = arith.subf %71, %74 : vector<4x9x9xf32>
    %76 = math.exp %75 : vector<4x9x9xf32>
    %cst_26 = arith.constant dense<0.000000e+00> : vector<4x9xf32>
    %77 = vector.multi_reduction <add>, %76, %cst_26 [2] : vector<4x9x9xf32> to vector<4x9xf32>
    %78 = vector.shape_cast %77 : vector<4x9xf32> to vector<4x9x1xf32>
    %79 = tpu.reciprocal %78 {approx = true} : vector<4x9x1xf32> -> vector<4x9x1xf32>
    %80 = vector.broadcast %79 : vector<4x9x1xf32> to vector<4x9x9xf32>
    %81 = arith.mulf %76, %80 : vector<4x9x9xf32>
    "tpu.trace_start"() <{level = 10 : i32, message = "hqk,hkd->hqd"}> : () -> ()
    %cst_27 = arith.constant dense<0.000000e+00> : vector<4x9x8xf32>
    %82 = tpu.matmul %81, %68, %cst_27 {dimension_numbers = #tpu.dot_dimension_numbers<[2], [1], [1], [2], [0, 0, 0, 1, 1, 2], [0], [0]>} : vector<4x9x9xf32>, vector<4x9x8xf32>, vector<4x9x8xf32> -> vector<4x9x8xf32>
    "tpu.trace_stop"() : () -> ()
    %83 = vector.extract_strided_slice %82 {offsets = [0, 0, 0], sizes = [1, 9, 8], strides = [1, 1, 1]} : vector<4x9x8xf32> to vector<1x9x8xf32>
    %84 = vector.shape_cast %83 : vector<1x9x8xf32> to vector<9x8xf32>
    %85 = vector.extract_strided_slice %82 {offsets = [1, 0, 0], sizes = [1, 9, 8], strides = [1, 1, 1]} : vector<4x9x8xf32> to vector<1x9x8xf32>
    %86 = vector.shape_cast %85 : vector<1x9x8xf32> to vector<9x8xf32>
    %87 = vector.extract_strided_slice %82 {offsets = [2, 0, 0], sizes = [1, 9, 8], strides = [1, 1, 1]} : vector<4x9x8xf32> to vector<1x9x8xf32>
    %88 = vector.shape_cast %87 : vector<1x9x8xf32> to vector<9x8xf32>
    %89 = vector.extract_strided_slice %82 {offsets = [3, 0, 0], sizes = [1, 9, 8], strides = [1, 1, 1]} : vector<4x9x8xf32> to vector<1x9x8xf32>
    %90 = vector.shape_cast %89 : vector<1x9x8xf32> to vector<9x8xf32>
    %91 = tpu.concatenate %84, %86, %88, %90 in 1 : vector<9x8xf32>, vector<9x8xf32>, vector<9x8xf32>, vector<9x8xf32> -> vector<9x32xf32>
    %c0_28 = arith.constant 0 : index
    %c0_29 = arith.constant 0 : index
    %c0_30 = arith.constant 0 : index
    %92 = vector.load %arg8[%c0_28, %c0_29, %c0_30] : memref<2x32x32xf32, #tpu.memory_space<vmem>>, vector<1x32x32xf32>
    %93 = vector.shape_cast %92 : vector<1x32x32xf32> to vector<32x32xf32>
    %cst_31 = arith.constant dense<0.000000e+00> : vector<9x32xf32>
    %94 = tpu.matmul %91, %93, %cst_31 {dimension_numbers = #tpu.dot_dimension_numbers<[1], [0], [0], [1], [0, 0, 1, 1], [], []>} : vector<9x32xf32>, vector<32x32xf32>, vector<9x32xf32> -> vector<9x32xf32>
    %c0_32 = arith.constant 0 : index
    %c0_33 = arith.constant 0 : index
    %c0_34 = arith.constant 0 : index
    %95 = vector.load %arg9[%c0_32, %c0_33, %c0_34] : memref<2x1x32xf32, #tpu.memory_space<vmem>>, vector<1x1x32xf32>
    %96 = vector.shape_cast %95 : vector<1x1x32xf32> to vector<1x32xf32>
    %97 = vector.broadcast %96 : vector<1x32xf32> to vector<9x32xf32>
    %98 = arith.addf %94, %97 : vector<9x32xf32>
    %99 = arith.addf %98, %5 : vector<9x32xf32>
    %c0_35 = arith.constant 0 : index
    %c0_36 = arith.constant 0 : index
    %c0_37 = arith.constant 0 : index
    %100 = vector.load %arg10[%c0_35, %c0_36, %c0_37] : memref<2x1x32xf32, #tpu.memory_space<vmem>>, vector<1x1x32xf32>
    %101 = vector.shape_cast %100 : vector<1x1x32xf32> to vector<1x32xf32>
    %c0_38 = arith.constant 0 : index
    %c0_39 = arith.constant 0 : index
    %c0_40 = arith.constant 0 : index
    %102 = vector.load %arg11[%c0_38, %c0_39, %c0_40] : memref<2x1x32xf32, #tpu.memory_space<vmem>>, vector<1x1x32xf32>
    %103 = vector.shape_cast %102 : vector<1x1x32xf32> to vector<1x32xf32>
    %cst_41 = arith.constant dense<0.000000e+00> : vector<9xf32>
    %104 = vector.multi_reduction <add>, %99, %cst_41 [1] : vector<9x32xf32> to vector<9xf32>
    %105 = vector.shape_cast %104 : vector<9xf32> to vector<9x1xf32>
    %cst_42 = arith.constant 3.200000e+01 : f32
    %106 = vector.broadcast %cst_42 : f32 to vector<9x1xf32>
    %107 = arith.divf %105, %106 : vector<9x1xf32>
    %108 = vector.broadcast %107 : vector<9x1xf32> to vector<9x32xf32>
    %109 = arith.subf %99, %108 : vector<9x32xf32>
    %110 = arith.mulf %109, %109 : vector<9x32xf32>
    %cst_43 = arith.constant dense<0.000000e+00> : vector<9xf32>
    %111 = vector.multi_reduction <add>, %110, %cst_43 [1] : vector<9x32xf32> to vector<9xf32>
    %112 = vector.shape_cast %111 : vector<9xf32> to vector<9x1xf32>
    %cst_44 = arith.constant 3.200000e+01 : f32
    %113 = vector.broadcast %cst_44 : f32 to vector<9x1xf32>
    %114 = arith.divf %112, %113 : vector<9x1xf32>
    %115 = vector.broadcast %107 : vector<9x1xf32> to vector<9x32xf32>
    %116 = arith.subf %99, %115 : vector<9x32xf32>
    %cst_45 = arith.constant 9.99999974E-6 : f32
    %117 = vector.broadcast %cst_45 : f32 to vector<9x1xf32>
    %118 = arith.addf %114, %117 : vector<9x1xf32>
    %119 = math.rsqrt %118 : vector<9x1xf32>
    %120 = vector.broadcast %119 : vector<9x1xf32> to vector<9x32xf32>
    %121 = arith.mulf %116, %120 : vector<9x32xf32>
    %122 = vector.broadcast %101 : vector<1x32xf32> to vector<9x32xf32>
    %123 = arith.mulf %121, %122 : vector<9x32xf32>
    %124 = vector.broadcast %103 : vector<1x32xf32> to vector<9x32xf32>
    %125 = arith.addf %123, %124 : vector<9x32xf32>
    %c0_46 = arith.constant 0 : index
    %c0_47 = arith.constant 0 : index
    %c0_48 = arith.constant 0 : index
    %126 = vector.load %arg12[%c0_46, %c0_47, %c0_48] : memref<2x32x64xf32, #tpu.memory_space<vmem>>, vector<1x32x64xf32>
    %127 = vector.shape_cast %126 : vector<1x32x64xf32> to vector<32x64xf32>
    %cst_49 = arith.constant dense<0.000000e+00> : vector<9x64xf32>
    %128 = tpu.matmul %125, %127, %cst_49 {dimension_numbers = #tpu.dot_dimension_numbers<[1], [0], [0], [1], [0, 0, 1, 1], [], []>} : vector<9x32xf32>, vector<32x64xf32>, vector<9x64xf32> -> vector<9x64xf32>
    %c0_50 = arith.constant 0 : index
    %c0_51 = arith.constant 0 : index
    %c0_52 = arith.constant 0 : index
    %129 = vector.load %arg13[%c0_50, %c0_51, %c0_52] : memref<2x1x64xf32, #tpu.memory_space<vmem>>, vector<1x1x64xf32>
    %130 = vector.shape_cast %129 : vector<1x1x64xf32> to vector<1x64xf32>
    %131 = vector.broadcast %130 : vector<1x64xf32> to vector<9x64xf32>
    %132 = arith.addf %128, %131 : vector<9x64xf32>
    %cst_53 = arith.constant 5.000000e-01 : f32
    %133 = vector.broadcast %cst_53 : f32 to vector<9x64xf32>
    %134 = arith.mulf %133, %132 : vector<9x64xf32>
    %cst_54 = arith.constant 0.707106769 : f32
    %135 = vector.broadcast %cst_54 : f32 to vector<9x64xf32>
    %136 = arith.mulf %132, %135 : vector<9x64xf32>
    %137 = math.erf %136 : vector<9x64xf32>
    %cst_55 = arith.constant 1.000000e+00 : f32
    %138 = vector.broadcast %cst_55 : f32 to vector<9x64xf32>
    %139 = arith.addf %138, %137 : vector<9x64xf32>
    %140 = arith.mulf %134, %139 : vector<9x64xf32>
    %c0_56 = arith.constant 0 : index
    %c0_57 = arith.constant 0 : index
    %c0_58 = arith.constant 0 : index
    %141 = vector.load %arg14[%c0_56, %c0_57, %c0_58] : memref<2x64x32xf32, #tpu.memory_space<vmem>>, vector<1x64x32xf32>
    %142 = vector.shape_cast %141 : vector<1x64x32xf32> to vector<64x32xf32>
    %cst_59 = arith.constant dense<0.000000e+00> : vector<9x32xf32>
    %143 = tpu.matmul %140, %142, %cst_59 {dimension_numbers = #tpu.dot_dimension_numbers<[1], [0], [0], [1], [0, 0, 1, 1], [], []>} : vector<9x64xf32>, vector<64x32xf32>, vector<9x32xf32> -> vector<9x32xf32>
    %c0_60 = arith.constant 0 : index
    %c0_61 = arith.constant 0 : index
    %c0_62 = arith.constant 0 : index
    %144 = vector.load %arg15[%c0_60, %c0_61, %c0_62] : memref<2x1x32xf32, #tpu.memory_space<vmem>>, vector<1x1x32xf32>
    %145 = vector.shape_cast %144 : vector<1x1x32xf32> to vector<1x32xf32>
    %146 = vector.broadcast %145 : vector<1x32xf32> to vector<9x32xf32>
    %147 = arith.addf %143, %146 : vector<9x32xf32>
    %148 = arith.addf %147, %99 : vector<9x32xf32>
    %c1 = arith.constant 1 : index
    %c0_63 = arith.constant 0 : index
    %c0_64 = arith.constant 0 : index
    %149 = vector.load %arg4[%c1, %c0_63, %c0_64] : memref<2x1x32xf32, #tpu.memory_space<vmem>>, vector<1x1x32xf32>
    %150 = vector.shape_cast %149 : vector<1x1x32xf32> to vector<1x32xf32>
    %c1_65 = arith.constant 1 : index
    %c0_66 = arith.constant 0 : index
    %c0_67 = arith.constant 0 : index
    %151 = vector.load %arg5[%c1_65, %c0_66, %c0_67] : memref<2x1x32xf32, #tpu.memory_space<vmem>>, vector<1x1x32xf32>
    %152 = vector.shape_cast %151 : vector<1x1x32xf32> to vector<1x32xf32>
    %cst_68 = arith.constant dense<0.000000e+00> : vector<9xf32>
    %153 = vector.multi_reduction <add>, %148, %cst_68 [1] : vector<9x32xf32> to vector<9xf32>
    %154 = vector.shape_cast %153 : vector<9xf32> to vector<9x1xf32>
    %cst_69 = arith.constant 3.200000e+01 : f32
    %155 = vector.broadcast %cst_69 : f32 to vector<9x1xf32>
    %156 = arith.divf %154, %155 : vector<9x1xf32>
    %157 = vector.broadcast %156 : vector<9x1xf32> to vector<9x32xf32>
    %158 = arith.subf %148, %157 : vector<9x32xf32>
    %159 = arith.mulf %158, %158 : vector<9x32xf32>
    %cst_70 = arith.constant dense<0.000000e+00> : vector<9xf32>
    %160 = vector.multi_reduction <add>, %159, %cst_70 [1] : vector<9x32xf32> to vector<9xf32>
    %161 = vector.shape_cast %160 : vector<9xf32> to vector<9x1xf32>
    %cst_71 = arith.constant 3.200000e+01 : f32
    %162 = vector.broadcast %cst_71 : f32 to vector<9x1xf32>
    %163 = arith.divf %161, %162 : vector<9x1xf32>
    %164 = vector.broadcast %156 : vector<9x1xf32> to vector<9x32xf32>
    %165 = arith.subf %148, %164 : vector<9x32xf32>
    %cst_72 = arith.constant 9.99999974E-6 : f32
    %166 = vector.broadcast %cst_72 : f32 to vector<9x1xf32>
    %167 = arith.addf %163, %166 : vector<9x1xf32>
    %168 = math.rsqrt %167 : vector<9x1xf32>
    %169 = vector.broadcast %168 : vector<9x1xf32> to vector<9x32xf32>
    %170 = arith.mulf %165, %169 : vector<9x32xf32>
    %171 = vector.broadcast %150 : vector<1x32xf32> to vector<9x32xf32>
    %172 = arith.mulf %170, %171 : vector<9x32xf32>
    %173 = vector.broadcast %152 : vector<1x32xf32> to vector<9x32xf32>
    %174 = arith.addf %172, %173 : vector<9x32xf32>
    %c1_73 = arith.constant 1 : index
    %c0_74 = arith.constant 0 : index
    %c0_75 = arith.constant 0 : index
    %175 = vector.load %arg6[%c1_73, %c0_74, %c0_75] : memref<2x32x96xf32, #tpu.memory_space<vmem>>, vector<1x32x96xf32>
    %176 = vector.shape_cast %175 : vector<1x32x96xf32> to vector<32x96xf32>
    %cst_76 = arith.constant dense<0.000000e+00> : vector<9x96xf32>
    %177 = tpu.matmul %174, %176, %cst_76 {dimension_numbers = #tpu.dot_dimension_numbers<[1], [0], [0], [1], [0, 0, 1, 1], [], []>} : vector<9x32xf32>, vector<32x96xf32>, vector<9x96xf32> -> vector<9x96xf32>
    %c1_77 = arith.constant 1 : index
    %c0_78 = arith.constant 0 : index
    %c0_79 = arith.constant 0 : index
    %178 = vector.load %arg7[%c1_77, %c0_78, %c0_79] : memref<2x1x96xf32, #tpu.memory_space<vmem>>, vector<1x1x96xf32>
    %179 = vector.shape_cast %178 : vector<1x1x96xf32> to vector<1x96xf32>
    %180 = vector.broadcast %179 : vector<1x96xf32> to vector<9x96xf32>
    %181 = arith.addf %177, %180 : vector<9x96xf32>
    %182 = vector.extract_strided_slice %181 {offsets = [0, 0], sizes = [9, 32], strides = [1, 1]} : vector<9x96xf32> to vector<9x32xf32>
    %183 = vector.extract_strided_slice %181 {offsets = [0, 32], sizes = [9, 32], strides = [1, 1]} : vector<9x96xf32> to vector<9x32xf32>
    %184 = vector.extract_strided_slice %181 {offsets = [0, 64], sizes = [9, 32], strides = [1, 1]} : vector<9x96xf32> to vector<9x32xf32>
    %185 = vector.extract_strided_slice %182 {offsets = [0, 0], sizes = [9, 8], strides = [1, 1]} : vector<9x32xf32> to vector<9x8xf32>
    %186 = vector.extract_strided_slice %182 {offsets = [0, 8], sizes = [9, 8], strides = [1, 1]} : vector<9x32xf32> to vector<9x8xf32>
    %187 = vector.extract_strided_slice %182 {offsets = [0, 16], sizes = [9, 8], strides = [1, 1]} : vector<9x32xf32> to vector<9x8xf32>
    %188 = vector.extract_strided_slice %182 {offsets = [0, 24], sizes = [9, 8], strides = [1, 1]} : vector<9x32xf32> to vector<9x8xf32>
    %189 = vector.shape_cast %185 : vector<9x8xf32> to vector<1x9x8xf32>
    %190 = vector.shape_cast %186 : vector<9x8xf32> to vector<1x9x8xf32>
    %191 = vector.shape_cast %187 : vector<9x8xf32> to vector<1x9x8xf32>
    %192 = vector.shape_cast %188 : vector<9x8xf32> to vector<1x9x8xf32>
    %193 = tpu.concatenate %189, %190, %191, %192 in 0 : vector<1x9x8xf32>, vector<1x9x8xf32>, vector<1x9x8xf32>, vector<1x9x8xf32> -> vector<4x9x8xf32>
    %194 = vector.extract_strided_slice %183 {offsets = [0, 0], sizes = [9, 8], strides = [1, 1]} : vector<9x32xf32> to vector<9x8xf32>
    %195 = vector.extract_strided_slice %183 {offsets = [0, 8], sizes = [9, 8], strides = [1, 1]} : vector<9x32xf32> to vector<9x8xf32>
    %196 = vector.extract_strided_slice %183 {offsets = [0, 16], sizes = [9, 8], strides = [1, 1]} : vector<9x32xf32> to vector<9x8xf32>
    %197 = vector.extract_strided_slice %183 {offsets = [0, 24], sizes = [9, 8], strides = [1, 1]} : vector<9x32xf32> to vector<9x8xf32>
    %198 = vector.shape_cast %194 : vector<9x8xf32> to vector<1x9x8xf32>
    %199 = vector.shape_cast %195 : vector<9x8xf32> to vector<1x9x8xf32>
    %200 = vector.shape_cast %196 : vector<9x8xf32> to vector<1x9x8xf32>
    %201 = vector.shape_cast %197 : vector<9x8xf32> to vector<1x9x8xf32>
    %202 = tpu.concatenate %198, %199, %200, %201 in 0 : vector<1x9x8xf32>, vector<1x9x8xf32>, vector<1x9x8xf32>, vector<1x9x8xf32> -> vector<4x9x8xf32>
    %203 = vector.extract_strided_slice %184 {offsets = [0, 0], sizes = [9, 8], strides = [1, 1]} : vector<9x32xf32> to vector<9x8xf32>
    %204 = vector.extract_strided_slice %184 {offsets = [0, 8], sizes = [9, 8], strides = [1, 1]} : vector<9x32xf32> to vector<9x8xf32>
    %205 = vector.extract_strided_slice %184 {offsets = [0, 16], sizes = [9, 8], strides = [1, 1]} : vector<9x32xf32> to vector<9x8xf32>
    %206 = vector.extract_strided_slice %184 {offsets = [0, 24], sizes = [9, 8], strides = [1, 1]} : vector<9x32xf32> to vector<9x8xf32>
    %207 = vector.shape_cast %203 : vector<9x8xf32> to vector<1x9x8xf32>
    %208 = vector.shape_cast %204 : vector<9x8xf32> to vector<1x9x8xf32>
    %209 = vector.shape_cast %205 : vector<9x8xf32> to vector<1x9x8xf32>
    %210 = vector.shape_cast %206 : vector<9x8xf32> to vector<1x9x8xf32>
    %211 = tpu.concatenate %207, %208, %209, %210 in 0 : vector<1x9x8xf32>, vector<1x9x8xf32>, vector<1x9x8xf32>, vector<1x9x8xf32> -> vector<4x9x8xf32>
    "tpu.trace_start"() <{level = 10 : i32, message = "hqd,hkd->hqk"}> : () -> ()
    %cst_80 = arith.constant dense<0.000000e+00> : vector<4x9x9xf32>
    %212 = tpu.matmul %193, %202, %cst_80 {dimension_numbers = #tpu.dot_dimension_numbers<[2], [2], [1], [1], [0, 0, 0, 1, 1, 1], [0], [0]>} : vector<4x9x8xf32>, vector<4x9x8xf32>, vector<4x9x9xf32> -> vector<4x9x9xf32>
    "tpu.trace_stop"() : () -> ()
    %cst_81 = arith.constant 0.353553385 : f32
    %213 = vector.broadcast %cst_81 : f32 to vector<4x9x9xf32>
    %214 = arith.mulf %212, %213 : vector<4x9x9xf32>
    %cst_82 = arith.constant dense<0xFF800000> : vector<4x9xf32>
    %215 = vector.multi_reduction <maximumf>, %214, %cst_82 [2] : vector<4x9x9xf32> to vector<4x9xf32>
    %216 = vector.shape_cast %215 : vector<4x9xf32> to vector<4x9x1xf32>
    %217 = vector.broadcast %216 : vector<4x9x1xf32> to vector<4x9x9xf32>
    %218 = arith.subf %214, %217 : vector<4x9x9xf32>
    %219 = math.exp %218 : vector<4x9x9xf32>
    %cst_83 = arith.constant dense<0.000000e+00> : vector<4x9xf32>
    %220 = vector.multi_reduction <add>, %219, %cst_83 [2] : vector<4x9x9xf32> to vector<4x9xf32>
    %221 = vector.shape_cast %220 : vector<4x9xf32> to vector<4x9x1xf32>
    %222 = tpu.reciprocal %221 {approx = true} : vector<4x9x1xf32> -> vector<4x9x1xf32>
    %223 = vector.broadcast %222 : vector<4x9x1xf32> to vector<4x9x9xf32>
    %224 = arith.mulf %219, %223 : vector<4x9x9xf32>
    "tpu.trace_start"() <{level = 10 : i32, message = "hqk,hkd->hqd"}> : () -> ()
    %cst_84 = arith.constant dense<0.000000e+00> : vector<4x9x8xf32>
    %225 = tpu.matmul %224, %211, %cst_84 {dimension_numbers = #tpu.dot_dimension_numbers<[2], [1], [1], [2], [0, 0, 0, 1, 1, 2], [0], [0]>} : vector<4x9x9xf32>, vector<4x9x8xf32>, vector<4x9x8xf32> -> vector<4x9x8xf32>
    "tpu.trace_stop"() : () -> ()
    %226 = vector.extract_strided_slice %225 {offsets = [0, 0, 0], sizes = [1, 9, 8], strides = [1, 1, 1]} : vector<4x9x8xf32> to vector<1x9x8xf32>
    %227 = vector.shape_cast %226 : vector<1x9x8xf32> to vector<9x8xf32>
    %228 = vector.extract_strided_slice %225 {offsets = [1, 0, 0], sizes = [1, 9, 8], strides = [1, 1, 1]} : vector<4x9x8xf32> to vector<1x9x8xf32>
    %229 = vector.shape_cast %228 : vector<1x9x8xf32> to vector<9x8xf32>
    %230 = vector.extract_strided_slice %225 {offsets = [2, 0, 0], sizes = [1, 9, 8], strides = [1, 1, 1]} : vector<4x9x8xf32> to vector<1x9x8xf32>
    %231 = vector.shape_cast %230 : vector<1x9x8xf32> to vector<9x8xf32>
    %232 = vector.extract_strided_slice %225 {offsets = [3, 0, 0], sizes = [1, 9, 8], strides = [1, 1, 1]} : vector<4x9x8xf32> to vector<1x9x8xf32>
    %233 = vector.shape_cast %232 : vector<1x9x8xf32> to vector<9x8xf32>
    %234 = tpu.concatenate %227, %229, %231, %233 in 1 : vector<9x8xf32>, vector<9x8xf32>, vector<9x8xf32>, vector<9x8xf32> -> vector<9x32xf32>
    %c1_85 = arith.constant 1 : index
    %c0_86 = arith.constant 0 : index
    %c0_87 = arith.constant 0 : index
    %235 = vector.load %arg8[%c1_85, %c0_86, %c0_87] : memref<2x32x32xf32, #tpu.memory_space<vmem>>, vector<1x32x32xf32>
    %236 = vector.shape_cast %235 : vector<1x32x32xf32> to vector<32x32xf32>
    %cst_88 = arith.constant dense<0.000000e+00> : vector<9x32xf32>
    %237 = tpu.matmul %234, %236, %cst_88 {dimension_numbers = #tpu.dot_dimension_numbers<[1], [0], [0], [1], [0, 0, 1, 1], [], []>} : vector<9x32xf32>, vector<32x32xf32>, vector<9x32xf32> -> vector<9x32xf32>
    %c1_89 = arith.constant 1 : index
    %c0_90 = arith.constant 0 : index
    %c0_91 = arith.constant 0 : index
    %238 = vector.load %arg9[%c1_89, %c0_90, %c0_91] : memref<2x1x32xf32, #tpu.memory_space<vmem>>, vector<1x1x32xf32>
    %239 = vector.shape_cast %238 : vector<1x1x32xf32> to vector<1x32xf32>
    %240 = vector.broadcast %239 : vector<1x32xf32> to vector<9x32xf32>
    %241 = arith.addf %237, %240 : vector<9x32xf32>
    %242 = arith.addf %241, %148 : vector<9x32xf32>
    %c1_92 = arith.constant 1 : index
    %c0_93 = arith.constant 0 : index
    %c0_94 = arith.constant 0 : index
    %243 = vector.load %arg10[%c1_92, %c0_93, %c0_94] : memref<2x1x32xf32, #tpu.memory_space<vmem>>, vector<1x1x32xf32>
    %244 = vector.shape_cast %243 : vector<1x1x32xf32> to vector<1x32xf32>
    %c1_95 = arith.constant 1 : index
    %c0_96 = arith.constant 0 : index
    %c0_97 = arith.constant 0 : index
    %245 = vector.load %arg11[%c1_95, %c0_96, %c0_97] : memref<2x1x32xf32, #tpu.memory_space<vmem>>, vector<1x1x32xf32>
    %246 = vector.shape_cast %245 : vector<1x1x32xf32> to vector<1x32xf32>
    %cst_98 = arith.constant dense<0.000000e+00> : vector<9xf32>
    %247 = vector.multi_reduction <add>, %242, %cst_98 [1] : vector<9x32xf32> to vector<9xf32>
    %248 = vector.shape_cast %247 : vector<9xf32> to vector<9x1xf32>
    %cst_99 = arith.constant 3.200000e+01 : f32
    %249 = vector.broadcast %cst_99 : f32 to vector<9x1xf32>
    %250 = arith.divf %248, %249 : vector<9x1xf32>
    %251 = vector.broadcast %250 : vector<9x1xf32> to vector<9x32xf32>
    %252 = arith.subf %242, %251 : vector<9x32xf32>
    %253 = arith.mulf %252, %252 : vector<9x32xf32>
    %cst_100 = arith.constant dense<0.000000e+00> : vector<9xf32>
    %254 = vector.multi_reduction <add>, %253, %cst_100 [1] : vector<9x32xf32> to vector<9xf32>
    %255 = vector.shape_cast %254 : vector<9xf32> to vector<9x1xf32>
    %cst_101 = arith.constant 3.200000e+01 : f32
    %256 = vector.broadcast %cst_101 : f32 to vector<9x1xf32>
    %257 = arith.divf %255, %256 : vector<9x1xf32>
    %258 = vector.broadcast %250 : vector<9x1xf32> to vector<9x32xf32>
    %259 = arith.subf %242, %258 : vector<9x32xf32>
    %cst_102 = arith.constant 9.99999974E-6 : f32
    %260 = vector.broadcast %cst_102 : f32 to vector<9x1xf32>
    %261 = arith.addf %257, %260 : vector<9x1xf32>
    %262 = math.rsqrt %261 : vector<9x1xf32>
    %263 = vector.broadcast %262 : vector<9x1xf32> to vector<9x32xf32>
    %264 = arith.mulf %259, %263 : vector<9x32xf32>
    %265 = vector.broadcast %244 : vector<1x32xf32> to vector<9x32xf32>
    %266 = arith.mulf %264, %265 : vector<9x32xf32>
    %267 = vector.broadcast %246 : vector<1x32xf32> to vector<9x32xf32>
    %268 = arith.addf %266, %267 : vector<9x32xf32>
    %c1_103 = arith.constant 1 : index
    %c0_104 = arith.constant 0 : index
    %c0_105 = arith.constant 0 : index
    %269 = vector.load %arg12[%c1_103, %c0_104, %c0_105] : memref<2x32x64xf32, #tpu.memory_space<vmem>>, vector<1x32x64xf32>
    %270 = vector.shape_cast %269 : vector<1x32x64xf32> to vector<32x64xf32>
    %cst_106 = arith.constant dense<0.000000e+00> : vector<9x64xf32>
    %271 = tpu.matmul %268, %270, %cst_106 {dimension_numbers = #tpu.dot_dimension_numbers<[1], [0], [0], [1], [0, 0, 1, 1], [], []>} : vector<9x32xf32>, vector<32x64xf32>, vector<9x64xf32> -> vector<9x64xf32>
    %c1_107 = arith.constant 1 : index
    %c0_108 = arith.constant 0 : index
    %c0_109 = arith.constant 0 : index
    %272 = vector.load %arg13[%c1_107, %c0_108, %c0_109] : memref<2x1x64xf32, #tpu.memory_space<vmem>>, vector<1x1x64xf32>
    %273 = vector.shape_cast %272 : vector<1x1x64xf32> to vector<1x64xf32>
    %274 = vector.broadcast %273 : vector<1x64xf32> to vector<9x64xf32>
    %275 = arith.addf %271, %274 : vector<9x64xf32>
    %cst_110 = arith.constant 5.000000e-01 : f32
    %276 = vector.broadcast %cst_110 : f32 to vector<9x64xf32>
    %277 = arith.mulf %276, %275 : vector<9x64xf32>
    %cst_111 = arith.constant 0.707106769 : f32
    %278 = vector.broadcast %cst_111 : f32 to vector<9x64xf32>
    %279 = arith.mulf %275, %278 : vector<9x64xf32>
    %280 = math.erf %279 : vector<9x64xf32>
    %cst_112 = arith.constant 1.000000e+00 : f32
    %281 = vector.broadcast %cst_112 : f32 to vector<9x64xf32>
    %282 = arith.addf %281, %280 : vector<9x64xf32>
    %283 = arith.mulf %277, %282 : vector<9x64xf32>
    %c1_113 = arith.constant 1 : index
    %c0_114 = arith.constant 0 : index
    %c0_115 = arith.constant 0 : index
    %284 = vector.load %arg14[%c1_113, %c0_114, %c0_115] : memref<2x64x32xf32, #tpu.memory_space<vmem>>, vector<1x64x32xf32>
    %285 = vector.shape_cast %284 : vector<1x64x32xf32> to vector<64x32xf32>
    %cst_116 = arith.constant dense<0.000000e+00> : vector<9x32xf32>
    %286 = tpu.matmul %283, %285, %cst_116 {dimension_numbers = #tpu.dot_dimension_numbers<[1], [0], [0], [1], [0, 0, 1, 1], [], []>} : vector<9x64xf32>, vector<64x32xf32>, vector<9x32xf32> -> vector<9x32xf32>
    %c1_117 = arith.constant 1 : index
    %c0_118 = arith.constant 0 : index
    %c0_119 = arith.constant 0 : index
    %287 = vector.load %arg15[%c1_117, %c0_118, %c0_119] : memref<2x1x32xf32, #tpu.memory_space<vmem>>, vector<1x1x32xf32>
    %288 = vector.shape_cast %287 : vector<1x1x32xf32> to vector<1x32xf32>
    %289 = vector.broadcast %288 : vector<1x32xf32> to vector<9x32xf32>
    %290 = arith.addf %286, %289 : vector<9x32xf32>
    %291 = arith.addf %290, %242 : vector<9x32xf32>
    %292 = vector.extract_strided_slice %291 {offsets = [0, 0], sizes = [1, 32], strides = [1, 1]} : vector<9x32xf32> to vector<1x32xf32>
    %c0_120 = arith.constant 0 : index
    %c0_121 = arith.constant 0 : index
    %293 = vector.load %arg16[%c0_120, %c0_121] : memref<1x32xf32, #tpu.memory_space<vmem>>, vector<1x32xf32>
    %c0_122 = arith.constant 0 : index
    %c0_123 = arith.constant 0 : index
    %294 = vector.load %arg17[%c0_122, %c0_123] : memref<1x32xf32, #tpu.memory_space<vmem>>, vector<1x32xf32>
    %cst_124 = arith.constant dense<0.000000e+00> : vector<1xf32>
    %295 = vector.multi_reduction <add>, %292, %cst_124 [1] : vector<1x32xf32> to vector<1xf32>
    %296 = vector.shape_cast %295 : vector<1xf32> to vector<1x1xf32>
    %cst_125 = arith.constant 3.200000e+01 : f32
    %297 = vector.broadcast %cst_125 : f32 to vector<1x1xf32>
    %298 = arith.divf %296, %297 : vector<1x1xf32>
    %299 = vector.broadcast %298 : vector<1x1xf32> to vector<1x32xf32>
    %300 = arith.subf %292, %299 : vector<1x32xf32>
    %301 = arith.mulf %300, %300 : vector<1x32xf32>
    %cst_126 = arith.constant dense<0.000000e+00> : vector<1xf32>
    %302 = vector.multi_reduction <add>, %301, %cst_126 [1] : vector<1x32xf32> to vector<1xf32>
    %303 = vector.shape_cast %302 : vector<1xf32> to vector<1x1xf32>
    %cst_127 = arith.constant 3.200000e+01 : f32
    %304 = vector.broadcast %cst_127 : f32 to vector<1x1xf32>
    %305 = arith.divf %303, %304 : vector<1x1xf32>
    %306 = vector.broadcast %298 : vector<1x1xf32> to vector<1x32xf32>
    %307 = arith.subf %292, %306 : vector<1x32xf32>
    %cst_128 = arith.constant 9.99999974E-6 : f32
    %308 = vector.broadcast %cst_128 : f32 to vector<1x1xf32>
    %309 = arith.addf %305, %308 : vector<1x1xf32>
    %310 = math.rsqrt %309 : vector<1x1xf32>
    %311 = vector.broadcast %310 : vector<1x1xf32> to vector<1x32xf32>
    %312 = arith.mulf %307, %311 : vector<1x32xf32>
    %313 = arith.mulf %312, %293 : vector<1x32xf32>
    %314 = arith.addf %313, %294 : vector<1x32xf32>
    %c0_129 = arith.constant 0 : index
    %c0_130 = arith.constant 0 : index
    %315 = vector.load %arg18[%c0_129, %c0_130] : memref<32x1xf32, #tpu.memory_space<vmem>>, vector<32x1xf32>
    %cst_131 = arith.constant dense<0.000000e+00> : vector<1x1xf32>
    %316 = tpu.matmul %314, %315, %cst_131 {dimension_numbers = #tpu.dot_dimension_numbers<[1], [0], [0], [1], [0, 0, 1, 1], [], []>} : vector<1x32xf32>, vector<32x1xf32>, vector<1x1xf32> -> vector<1x1xf32>
    %c0_132 = arith.constant 0 : index
    %c0_133 = arith.constant 0 : index
    %317 = vector.load %arg19[%c0_132, %c0_133] : memref<1x1xf32, #tpu.memory_space<vmem>>, vector<1x1xf32>
    %318 = arith.addf %316, %317 : vector<1x1xf32>
    %c0_134 = arith.constant 0 : index
    %c0_135 = arith.constant 0 : index
    %c0_136 = arith.constant 0 : index
    %319 = vector.load %arg20[%c0_134, %c0_135, %c0_136] : memref<1x1x1xf32, #tpu.memory_space<vmem>>, vector<1x1x1xf32>
    %320 = vector.shape_cast %319 : vector<1x1x1xf32> to vector<1x1xf32>
    %321 = vector.shape_cast %318 : vector<1x1xf32> to vector<1x1x1xf32>
    tpu.vector_store %arg20[%c0_134, %c0_135, %c0_136], %321 {strides = array<i32>} : memref<1x1x1xf32, #tpu.memory_space<vmem>>, vector<1x1x1xf32>,
    return
  }
  func.func @transform_0(%arg0: i32) -> (i32, i32, i32) {
    %c0_i32 = arith.constant 0 : i32
    %c0_i32_0 = arith.constant 0 : i32
    %c0_i32_1 = arith.constant 0 : i32
    return %arg0, %c0_i32, %c0_i32_0 : i32, i32, i32
  }
  func.func @transform_1(%arg0: i32) -> (i32, i32) {
    %c0_i32 = arith.constant 0 : i32
    %c0_i32_0 = arith.constant 0 : i32
    %c0_i32_1 = arith.constant 0 : i32
    return %c0_i32, %c0_i32_0 : i32, i32
  }
  func.func @transform_2(%arg0: i32) -> (i32, i32) {
    %c0_i32 = arith.constant 0 : i32
    %c0_i32_0 = arith.constant 0 : i32
    %c0_i32_1 = arith.constant 0 : i32
    return %c0_i32, %c0_i32_0 : i32, i32
  }
  func.func @transform_3(%arg0: i32) -> (i32, i32, i32) {
    %c0_i32 = arith.constant 0 : i32
    %c0_i32_0 = arith.constant 0 : i32
    %c0_i32_1 = arith.constant 0 : i32
    %c0_i32_2 = arith.constant 0 : i32
    return %c0_i32, %c0_i32_0, %c0_i32_1 : i32, i32, i32
  }
  func.func @transform_4(%arg0: i32) -> (i32, i32, i32) {
    %c0_i32 = arith.constant 0 : i32
    %c0_i32_0 = arith.constant 0 : i32
    %c0_i32_1 = arith.constant 0 : i32
    %c0_i32_2 = arith.constant 0 : i32
    return %c0_i32, %c0_i32_0, %c0_i32_1 : i32, i32, i32
  }
  func.func @transform_5(%arg0: i32) -> (i32, i32, i32) {
    %c0_i32 = arith.constant 0 : i32
    %c0_i32_0 = arith.constant 0 : i32
    %c0_i32_1 = arith.constant 0 : i32
    %c0_i32_2 = arith.constant 0 : i32
    return %c0_i32, %c0_i32_0, %c0_i32_1 : i32, i32, i32
  }
  func.func @transform_6(%arg0: i32) -> (i32, i32, i32) {
    %c0_i32 = arith.constant 0 : i32
    %c0_i32_0 = arith.constant 0 : i32
    %c0_i32_1 = arith.constant 0 : i32
    %c0_i32_2 = arith.constant 0 : i32
    return %c0_i32, %c0_i32_0, %c0_i32_1 : i32, i32, i32
  }
  func.func @transform_7(%arg0: i32) -> (i32, i32, i32) {
    %c0_i32 = arith.constant 0 : i32
    %c0_i32_0 = arith.constant 0 : i32
    %c0_i32_1 = arith.constant 0 : i32
    %c0_i32_2 = arith.constant 0 : i32
    return %c0_i32, %c0_i32_0, %c0_i32_1 : i32, i32, i32
  }
  func.func @transform_8(%arg0: i32) -> (i32, i32, i32) {
    %c0_i32 = arith.constant 0 : i32
    %c0_i32_0 = arith.constant 0 : i32
    %c0_i32_1 = arith.constant 0 : i32
    %c0_i32_2 = arith.constant 0 : i32
    return %c0_i32, %c0_i32_0, %c0_i32_1 : i32, i32, i32
  }
  func.func @transform_9(%arg0: i32) -> (i32, i32, i32) {
    %c0_i32 = arith.constant 0 : i32
    %c0_i32_0 = arith.constant 0 : i32
    %c0_i32_1 = arith.constant 0 : i32
    %c0_i32_2 = arith.constant 0 : i32
    return %c0_i32, %c0_i32_0, %c0_i32_1 : i32, i32, i32
  }
  func.func @transform_10(%arg0: i32) -> (i32, i32, i32) {
    %c0_i32 = arith.constant 0 : i32
    %c0_i32_0 = arith.constant 0 : i32
    %c0_i32_1 = arith.constant 0 : i32
    %c0_i32_2 = arith.constant 0 : i32
    return %c0_i32, %c0_i32_0, %c0_i32_1 : i32, i32, i32
  }
  func.func @transform_11(%arg0: i32) -> (i32, i32, i32) {
    %c0_i32 = arith.constant 0 : i32
    %c0_i32_0 = arith.constant 0 : i32
    %c0_i32_1 = arith.constant 0 : i32
    %c0_i32_2 = arith.constant 0 : i32
    return %c0_i32, %c0_i32_0, %c0_i32_1 : i32, i32, i32
  }
  func.func @transform_12(%arg0: i32) -> (i32, i32, i32) {
    %c0_i32 = arith.constant 0 : i32
    %c0_i32_0 = arith.constant 0 : i32
    %c0_i32_1 = arith.constant 0 : i32
    %c0_i32_2 = arith.constant 0 : i32
    return %c0_i32, %c0_i32_0, %c0_i32_1 : i32, i32, i32
  }
  func.func @transform_13(%arg0: i32) -> (i32, i32, i32) {
    %c0_i32 = arith.constant 0 : i32
    %c0_i32_0 = arith.constant 0 : i32
    %c0_i32_1 = arith.constant 0 : i32
    %c0_i32_2 = arith.constant 0 : i32
    return %c0_i32, %c0_i32_0, %c0_i32_1 : i32, i32, i32
  }
  func.func @transform_14(%arg0: i32) -> (i32, i32, i32) {
    %c0_i32 = arith.constant 0 : i32
    %c0_i32_0 = arith.constant 0 : i32
    %c0_i32_1 = arith.constant 0 : i32
    %c0_i32_2 = arith.constant 0 : i32
    return %c0_i32, %c0_i32_0, %c0_i32_1 : i32, i32, i32
  }
  func.func @transform_15(%arg0: i32) -> (i32, i32) {
    %c0_i32 = arith.constant 0 : i32
    %c0_i32_0 = arith.constant 0 : i32
    %c0_i32_1 = arith.constant 0 : i32
    return %c0_i32, %c0_i32_0 : i32, i32
  }
  func.func @transform_16(%arg0: i32) -> (i32, i32) {
    %c0_i32 = arith.constant 0 : i32
    %c0_i32_0 = arith.constant 0 : i32
    %c0_i32_1 = arith.constant 0 : i32
    return %c0_i32, %c0_i32_0 : i32, i32
  }
  func.func @transform_17(%arg0: i32) -> (i32, i32) {
    %c0_i32 = arith.constant 0 : i32
    %c0_i32_0 = arith.constant 0 : i32
    %c0_i32_1 = arith.constant 0 : i32
    return %c0_i32, %c0_i32_0 : i32, i32
  }
  func.func @transform_18(%arg0: i32) -> (i32, i32) {
    %c0_i32 = arith.constant 0 : i32
    %c0_i32_0 = arith.constant 0 : i32
    %c0_i32_1 = arith.constant 0 : i32
    return %c0_i32, %c0_i32_0 : i32, i32
  }
  func.func @transform_19(%arg0: i32) -> (i32, i32, i32) {
    %c0_i32 = arith.constant 0 : i32
    %c0_i32_0 = arith.constant 0 : i32
    %c0_i32_1 = arith.constant 0 : i32
    return %arg0, %c0_i32, %c0_i32_0 : i32, i32, i32
  }
}

</mosaic_0001>

<bundles_post_ra>
// kernel: tpu_custom_call.1
= control target key start
LH: loop header
LB: loop body
LE: loop exit
PB: predicated region body
PF: predicated region fallthrough
CT: control target
= control target key end

     0   :  { %s3495_s0 = inlined_call_operand.vmem [shape: f32[2,8,32], index: 0, kind: input, shape index: {}]   ;;  %s3496_s1 = inlined_call_operand.hbm [shape: f32[1,32], index: 1, kind: input, shape index: {}]   ;;  %s3497_s2 = inlined_call_operand.vmem [shape: f32[9,32], index: 2, kind: input, shape index: {}]   ;;  %s3498_s3 = inlined_call_operand.vmem [shape: f32[2,1,32], index: 3, kind: input, shape index: {}]   ;;  %s3499_s4 = inlined_call_operand.vmem [shape: f32[2,1,32], index: 4, kind: input, shape index: {}]   ;;  %s3500_s5 = inlined_call_operand.vmem [shape: f32[2,32,96], index: 5, kind: input, shape index: {}]   ;;  %s3501_s6 = inlined_call_operand.vmem [shape: f32[2,1,96], index: 6, kind: input, shape index: {}]   ;;  %s3502_s7 = inlined_call_operand.vmem [shape: f32[2,32,32], index: 7, kind: input, shape index: {}]   ;;  %s3503_s8 = inlined_call_operand.vmem [shape: f32[2,1,32], index: 8, kind: input, shape index: {}]   ;;  %s3504_s9 = inlined_call_operand.hbm [shape: f32[2,1,32], index: 9, kind: input, shape index: {}]   ;;  %s3505_s10 = inlined_call_operand.vmem [shape: f32[2,1,32], index: 10, kind: input, shape index: {}]   ;;  %s3506_s11 = inlined_call_operand.vmem [shape: f32[2,32,64], index: 11, kind: input, shape index: {}]   ;;  %s3507_s12 = inlined_call_operand.vmem [shape: f32[2,1,64], index: 12, kind: input, shape index: {}]   ;;  %s3508_s13 = inlined_call_operand.vmem [shape: f32[2,64,32], index: 13, kind: input, shape index: {}]   ;;  %s3509_s14 = inlined_call_operand.vmem [shape: f32[2,1,32], index: 14, kind: input, shape index: {}]   ;;  %s3510_s15 = inlined_call_operand.hbm [shape: f32[1,32], index: 15, kind: input, shape index: {}]   ;;  %s3511_s16 = inlined_call_operand.vmem [shape: f32[1,32], index: 16, kind: input, shape index: {}]   ;;  %s3512_s17 = inlined_call_operand.vmem [shape: f32[32,1], index: 17, kind: input, shape index: {}]   ;;  %s3513_s18 = inlined_call_operand.<no memory space> [shape: f32[1,1], index: 18, kind: input, shape index: {}]   ;;  %s3514_s19 = inlined_call_operand.vmem [shape: f32[2,1,1], index: 19, kind: output, shape index: {}]  }
   0x1   :  { %3523 = sst [smem:[#allocation10_spill]] %s3495_s0  ;;  %v24_v0 = vstv %s3513_s18 }
   0x2   :  { %3524 = sst [smem:[#allocation11_spill]] %s3496_s1  ;;  %25 = vst [vmem:[#allocation2] sm:$0x1] %v24_v0 }
   0x3   :  { %3525 = sst [smem:[#allocation12_spill]] %s3497_s2 }
   0x4   :  { %3526 = sst [smem:[#allocation13_spill]] %s3498_s3 }
   0x5   :  { %3527 = sst [smem:[#allocation14_spill]] %s3504_s9 }
   0x6   :  { %26 = vsyncpa [#allocation4], 0 }
   0x7   :  { %27 = vsyncpa [#allocation6], 0  ;;  %s2883_s20 = smov 0  }
   0x8 LB: > { %s3528_s9 = sld [smem:[#allocation14_spill]]  ;;  %s2892_s2 = sadd.s32 4294967295, %s2764_s20   ;;  %s2764_s20 = sphi %s2883_s20, %s33_s20  }
   0x9   : > { %p2376_p0 = scmp.ge.s32.totalorder %s2764_s20, 1  ;;  %p468_p1 = scmp.lt.s32.totalorder %s2764_s20, 3 }
   0xa   : > { %p2514_p2 = scmp.eq.s32.totalorder %s2892_s2, 0  ;;  %s2766_s23 = smov [#allocation5]  }
   0xb   : > { %p2897_p3 = pnand %p2376_p0, %p468_p1  ;;  %s514_s24 = sshll.u32 %s2766_s23, 4  ;;  %s515_s24 = int_to_ptr.vmem [resolvable:$true] %s514_s24 }
   0xc   : > { %s3530_s26 = sld [smem:[#allocation11_spill]]  ;;  %s2767_s29 = smov [#allocation3]  }
   0xd   : > { %p2504_p4 = pneg %p2897_p3  ;;  %s482_s0 = sshll.u32 %s2767_s29, 4  ;;  %s483_s0 = int_to_ptr.vmem [resolvable:$true] %s482_s0 }
   0xe   : > { %s512_s22 = sshll.u32 %s3528_s9, 4  ;;  %s542_s1 = sshll.u32 %s3510_s15, 4  ;;  %s513_s22 = int_to_ptr.hbm [resolvable:$true] %s512_s22  ;;  %s543_s1 = int_to_ptr.hbm [resolvable:$true] %s542_s1 }
   0xf   : > { %p2908_p5 = pnand %p2514_p2, %p2504_p4  ;;  %s2768_s23 = smov 16  }
  0x10   : > { %s2769_s9 = smov 1   ;;  %s2770_s25 = smov [#allocation7]  }
  0x11   : > { %2510 = dma.hbm_to_vmem [thread:$0]  (!%p2908_p5), %s513_s22, 32, %s515_s24, [#allocation6], %s2768_s23, %s2768_s23, %s2769_s9  }
  0x12   : > { %s480_s27 = sshll.u32 %s3530_s26, 4  ;;  %s544_s3 = sshll.u32 %s2770_s25, 4  ;;  %s481_s27 = int_to_ptr.hbm [resolvable:$true] %s480_s27  ;;  %s545_s3 = int_to_ptr.vmem [resolvable:$true] %s544_s3 }
  0x13   : > { %2507 = dma.hbm_to_vmem [thread:$0]  (!%p2908_p5), %s481_s27, 16, %s483_s0, [#allocation4]  }
  0x14   : > { %2513 = dma.hbm_to_vmem [thread:$0]  (!%p2908_p5), %s543_s1, 16, %s545_s3, [#allocation6]  }
  0x15   : > { %573 = sbr.rel (%p2897_p3) target bundleno = 4498 (0x1192), region = 96 }
  0x1a   : > { %2755 = dma.done.wait (%p2514_p2), [#allocation4], 16  }
  0x1b   : > { %2757 = vsyncadd (%p2514_p2), [#allocation4], 4294967280 }
  0x1c   : > { %2759 = dma.done.wait (%p2514_p2), [#allocation6], 48  }
  0x1d   : > { %2761 = vsyncadd (%p2514_p2), [#allocation6], 4294967248  ;;  %p637_p6 = scmp.lt.s32.totalorder %s2892_s2, 1  ;;  %s3532_s24 = sld [smem:[#allocation10_spill]]  ;;  %v644_v1 = vld [vmem:[#allocation3] sm:$0x1] }
  0x1e   : > { %vm649_vm0 = vcmask 1040384   ;;  %s3533_s29 = sld [smem:[#allocation12_spill]]  ;;  %vm657_vm1 = vcmask 261120   ;;  %vm661_vm2 = vcmask 253952   ;;  %v2771_v11 = vmov 32.0   ;;  %v723_v28 = vld [vmem:[%s3500_s5 + $0x18] sm:$0xff] }
  0x1f   : > { %s3539_s2 = smov (!%p637_p6, %s2892_s2), 1  ;;  %2568 = vrcp.f32 %v2771_v11  ;;  %746 = vmatpush.msra.mxu0 %v723_v28  ;;  %v722_v29 = vld [vmem:[%s3500_s5 + $0x10] sm:$0xff]  ;;  %v721_v30 = vld [vmem:[%s3500_s5 + $0x8] sm:$0xff]  ;;  %v720_v31 = vld [vmem:[%s3500_s5] sm:$0xff]  ;;  %s3534_s27 = sld [smem:[#allocation13_spill]]  ;;  %vm775_vm10 = vcmask 64512  }
  0x20   : > { %s2385_s9 = sshll.u32 %s3539_s2, 3  ;;  %v2553_v50 = vld [vmem:[%s3499_s4] ss:$0 sm:$0xff]  ;;  %s2772_s1 = smov 120   ;;  %vm920_vm11 = vcmask 72704   ;;  %vm924_vm12 = vcmask 65536  }
  0x21   : > { %747 = vmatpush.msra.mxu0 %v722_v29  ;;  %v2554_v60 = vld [vmem:[%s3501_s6] ss:$0 sm:$0xff]  ;;  %s2773_s23 = smov 112   ;;  %s2774_s25 = smov 104   ;;  %vm1180_vm13 = vcmask 130048   ;;  %vm1183_vm14 = vcmask 195584  }
  0x22   : > { %s2775_s3 = smov 96   ;;  %s3519_s22 = smov 8  }
  0x23   : > { %s640_s26 = scalar_lea.vmem %s3532_s24, %s2385_s9  ;;  %748 = vmatpush.msra.mxu0 %v721_v30  ;;  %s3521_s9 = smov 64  }
  0x24   : > { %v645_v2 = vld [vmem:[%s640_s26] sm:$0xff]  ;;  %v652_v7 = vld [vmem:[%s3533_s29 + $0x8] sm:$0x1]  ;;  %s3517_s18 = smov 16   ;;  %s2779_s24 = smov 24  }
  0x25   : > { %v647_v3 = vrot.slane %v645_v2, 7  ;;  %v651_v4 = vld [vmem:[%s3533_s29] sm:$0xff]  ;;  %v2569_v12 = vpop.eup %2568  ;;  %749 = vmatpush.msra.mxu0 %v720_v31 }
  0x26   : > { %v666_v13 = vmul.f32 32.0, %v2569_v12  ;;  %vm670_vm3 = vweird.f32 %v2569_v12  ;;  %v2552_v46 = vld [vmem:[%s3534_s27] ss:$0 sm:$0xff] }
  0x27   : > { %v650_v5 = vsel %vm649_vm0, %v644_v1, %v647_v3  ;;  %v2950_v9 = vadd.f32 %v652_v7, %v647_v3 }
  0x28   : > { %v2943_v6 = vadd.f32 %v651_v4, %v650_v5  ;;  %v667_v14 = vsub.f32 1.0, %v666_v13 }
  0x29   : > { %v662_v10 = vsel %vm661_vm2, %v2950_v9, 0.0 }
  0x2a   : > { %v658_v8 = vsel %vm657_vm1, %v2943_v6, 0.0  ;;  %v668_v15 = vmul.f32 %v2569_v12, %v667_v14 }
  0x2b   : > { %659 = vadd.xlane.f32.xlu0 %v658_v8 }
  0x2c   : > { %v669_v16 = vadd.f32 %v2569_v12, %v668_v15 }
  0x2e   : > { %v2954_v17 = vsel %vm670_vm3, %v2569_v12, %v669_v16 }
  0x33   : > { %663 = vadd.xlane.f32.xlu0 %v662_v10 }
  0x9e   : > { %v660_v18 = vpop.xlane.xlu0 %659 }
  0x9f   : > { %v672_v19 = vmul.f32 %v2954_v17, %v660_v18 }
  0xa1   : > { %v674_v20 = vsub.f32 %v2943_v6, %v672_v19 }
  0xa3   : > { %v676_v21 = vmul.f32 %v674_v20, %v674_v20 }
  0xa5   : > { %v678_v22 = vsel %vm657_vm1, %v676_v21, 0.0 }
  0xa6   : > { %679 = vadd.xlane.f32.xlu1 %v678_v22  ;;  %v664_v23 = vpop.xlane.xlu0 %663 }
  0xa7   : > { %v673_v24 = vmul.f32 %v2954_v17, %v664_v23 }
  0xa9   : > { %v675_v25 = vsub.f32 %v2950_v9, %v673_v24 }
  0xab   : > { %v677_v26 = vmul.f32 %v675_v25, %v675_v25 }
  0xad   : > { %v681_v27 = vsel %vm661_vm2, %v677_v26, 0.0 }
  0xae   : > { %682 = vadd.xlane.f32.xlu1 %v681_v27 }
 0x119   : > { %v680_v32 = vpop.xlane.xlu1 %679 }
 0x11a   : > { %v684_v33 = vmul.f32 %v680_v32, %v2954_v17 }
 0x11c   : > { %v686_v34 = vadd.f32 1e-05, %v684_v33 }
 0x11e   : > { %2570 = vrsqrt.f32 %v686_v34  ;;  %vm694_vm5 = vweird.f32 %v686_v34 }
 0x121   : > { %v683_v35 = vpop.xlane.xlu1 %682 }
 0x122   : > { %v685_v36 = vmul.f32 %v683_v35, %v2954_v17 }
 0x124   : > { %v2571_v37 = vpop.eup %2570  ;;  %v687_v38 = vadd.f32 1e-05, %v685_v36 }
 0x125   : > { %v689_v39 = vmul.f32 %v2571_v37, %v686_v34  ;;  %vm695_vm4 = vweird.f32 %v2571_v37 }
 0x126   : > { %2572 = vrsqrt.f32 %v687_v38  ;;  %vm696_vm6 = vmor %vm694_vm5, %vm695_vm4  ;;  %vm704_vm8 = vweird.f32 %v687_v38 }
 0x127   : > { %v690_v40 = vmul.f32 %v2571_v37, %v689_v39 }
 0x129   : > { %v691_v41 = vmul.f32 0.5, %v690_v40 }
 0x12b   : > { %v692_v42 = vsub.f32 1.5, %v691_v41 }
 0x12c   : > { %v2573_v43 = vpop.eup %2572 }
 0x12d   : > { %v693_v44 = vmul.f32 %v2571_v37, %v692_v42  ;;  %v699_v45 = vmul.f32 %v2573_v43, %v687_v38  ;;  %vm705_vm7 = vweird.f32 %v2573_v43 }
 0x12e   : > { %vm706_vm9 = vmor %vm704_vm8, %vm705_vm7 }
 0x12f   : > { %v697_v47 = vsel %vm696_vm6, %v2571_v37, %v693_v44  ;;  %v700_v48 = vmul.f32 %v2573_v43, %v699_v45 }
 0x130   : > { %v708_v49 = vmul.f32 %v697_v47, %v674_v20 }
 0x131   : > { %v701_v51 = vmul.f32 0.5, %v700_v48 }
 0x132   : > { %v713_v52 = vmul.f32 %v2552_v46, %v708_v49 }
 0x133   : > { %v702_v53 = vsub.f32 1.5, %v701_v51 }
 0x134   : > { %v718_v54 = vadd.f32 %v2553_v50, %v713_v52 }
 0x135   : > { %v703_v55 = vmul.f32 %v2573_v43, %v702_v53 }
 0x136   : > { %2386 = vmatmul.msk.f32.vlgmr.msra.gmra.mxu0 %vm657_vm1, %v718_v54 }
 0x137   : > { %v707_v56 = vsel %vm706_vm9, %v2573_v43, %v703_v55 }
 0x138   : > { %v709_v57 = vmul.f32 %v707_v56, %v675_v25 }
 0x13a   : > { %v714_v58 = vmul.f32 %v2552_v46, %v709_v57 }
 0x13c   : > { %v719_v59 = vadd.f32 %v2553_v50, %v714_v58 }
 0x13e   : > { %2387 = vmatmul.msk.f32.gmra.mxu0 %vm657_vm1, %v719_v59 }
 0x1b3   : > { %v751_v61 = vpop.f32.mrf.mxu0 }
 0x1b4   : > { %v2987_v62 = vadd.f32 %v2554_v60, %v751_v61 }
 0x1b6   : > { %759 = vrot.lane.b32.xlu0 %v2987_v62, %s2772_s1  ;;  %763 = vrot.lane.b32.xlu1 %v2987_v62, %s2773_s23 }
 0x1bb   : > { %v754_v63 = vpop.f32.mrf.mxu0 }
 0x1bc   : > { %v2993_v0 = vadd.f32 %v2554_v60, %v754_v63 }
 0x1be   : > { %761 = vrot.lane.b32.xlu2 %v2993_v0, %s2772_s1 }
 0x1c6   : > { %765 = vrot.lane.b32.xlu2 %v2993_v0, %s2773_s23 }
 0x1ce   : > { %769 = vrot.lane.b32.xlu2 %v2993_v0, %s2774_s25 }
 0x1d6   : > { %767 = vrot.lane.b32.xlu2 %v2987_v62, %s2774_s25 }
 0x218   : > { %v762_v1 = vpop.permute.xlu2 %761 }
 0x219   : > { %809 = vrot.lane.b32.xlu2 %v762_v1, %s2775_s3 }
 0x220   : > { %v3004_v2 = vpop.permute.xlu2 %765 }
 0x221   : > { %844 = vrot.lane.b32.xlu0 %v3004_v2, %s2775_s3 }
 0x228   : > { %v3008_v3 = vpop.permute.xlu2 %769  ;;  %v3010_v4 = vpop.permute.xlu1 %763 }
 0x229   : > { %v3012_v5 = vpop.permute.xlu0 %759  ;;  %879 = vrot.lane.b32.xlu0 %v3008_v3, %s2775_s3  ;;  %842 = vrot.lane.b32.xlu1 %v3010_v4, %s2775_s3 }
 0x22a   : > { %807 = vrot.lane.b32.xlu2 %v3012_v5, %s2775_s3  ;;  %v2542_v43 = vpack.i.bf16 %v3010_v4, %v3012_v5 }
 0x230   : > { %v3020_v7 = vpop.permute.xlu2 %767 }
 0x231   : > { %771 = vrot.lane.b32.xlu0 %v2987_v62, %s2775_s3  ;;  %773 = vrot.lane.b32.xlu1 %v2993_v0, %s2775_s3 }
 0x232   : > { %877 = vrot.lane.b32.xlu2 %v3020_v7, %s2775_s3 }
 0x239   : > { %1048 = vrot.lane.b32.xlu1 %v762_v1, %s3521_s9 }
 0x273   : > { %v810_v8 = vpop.permute.xlu2 %809 }
 0x274   : > { %2392 = vmatpush.xpose.msk.msra.mxu2 %vm775_vm10, %v810_v8 }
 0x284   : > { %v808_v10 = vpop.permute.xlu2 %807 }
 0x285   : > { %2393 = vmatpush.xpose.msk.msra.mxu2 %vm775_vm10, %v808_v10 }
 0x288   : > { %2394 = vmatmul.msk.f32.vlgmr.msra.gmra.mxu2 %vm775_vm10, %v3012_v5 }
 0x28c   : > { %v878_v14 = vpop.permute.xlu2 %877 }
 0x290   : > { %2395 = vmatmul.msk.f32.gmra.mxu2 %vm775_vm10, %v762_v1 }
 0x293   : > { %v845_v11 = vpop.permute.xlu0 %844 }
 0x294   : > { %2396 = vmatpush.xpose.msk.msra.mxu3 %vm775_vm10, %v845_v11 }
 0x29b   : > { %v843_v12 = vpop.permute.xlu1 %842  ;;  %v880_v13 = vpop.permute.xlu0 %879 }
 0x29c   : > { %2397 = vmatpush.xpose.msk.msra.mxu3 %vm775_vm10, %v843_v12  ;;  %2400 = vmatpush.xpose.msk.msrb.mxu0 %vm775_vm10, %v880_v13 }
 0x29f   : > { %2398 = vmatmul.msk.f32.vlgmr.msra.gmra.mxu3 %vm775_vm10, %v3010_v4 }
 0x2a0   : > { %2401 = vmatpush.xpose.msk.msrb.mxu0 %vm775_vm10, %v878_v14 }
 0x2a3   : > { %v774_v15 = vpop.permute.xlu1 %773  ;;  %2402 = vmatmul.msk.f32.vlgmr.msrb.gmra.mxu0 %vm775_vm10, %v3020_v7  ;;  %v772_v16 = vpop.permute.xlu0 %771 }
 0x2a4   : > { %2388 = vmatpush.xpose.msk.msra.mxu1 %vm775_vm10, %v774_v15 }
 0x2a7   : > { %2399 = vmatmul.msk.f32.gmra.mxu3 %vm775_vm10, %v3004_v2 }
 0x2a8   : > { %2389 = vmatpush.xpose.msk.msra.mxu1 %vm775_vm10, %v772_v16 }
 0x2ab   : > { %v1049_v18 = vpop.permute.xlu1 %1048  ;;  %2390 = vmatmul.msk.f32.vlgmr.msra.gmra.mxu1 %vm775_vm10, %v2987_v62  ;;  %2403 = vmatmul.msk.f32.gmra.mxu0 %vm775_vm10, %v3008_v3 }
 0x2ac   : > { %2407 = vmatpush.msk.msrb.mxu2 %vm649_vm0, %v1049_v18 }
 0x2b3   : > { %2391 = vmatmul.msk.f32.gmra.mxu1 %vm775_vm10, %v2993_v0 }
 0x30b   : > { %v836_v32 = vpop.f32.mrf.mxu2 }
 0x30c   : > { %v914_v36 = vmul.f32 0.35355338, %v836_v32 }
 0x30e   : > { %v928_v38 = vsel %vm920_vm11, %v914_v36, -inf }
 0x313   : > { %v839_v40 = vpop.f32.mrf.mxu2 }
 0x314   : > { %v915_v41 = vmul.f32 0.35355338, %v839_v40 }
 0x316   : > { %v931_v42 = vsel %vm924_vm12, %v915_v41, -inf }
 0x320   : > { %v906_v24 = vpop.f32.mrf.mxu0 }
 0x321   : > { %v918_v29 = vmul.f32 0.35355338, %v906_v24 }
 0x322   : > { %v871_v19 = vpop.f32.mrf.mxu3 }
 0x323   : > { %v916_v20 = vmul.f32 0.35355338, %v871_v19  ;;  %v940_v33 = vsel %vm920_vm11, %v918_v29, -inf }
 0x325   : > { %v934_v21 = vsel %vm920_vm11, %v916_v20, -inf }
 0x326   : > { %935 = vmax.xlane.f32.xlu1 %v934_v21 }
 0x328   : > { %v801_v22 = vpop.f32.mrf.mxu1  ;;  %v909_v35 = vpop.f32.mrf.mxu0 }
 0x329   : > { %v3054_v23 = vmul.f32 0.35355338, %v801_v22  ;;  %v919_v37 = vmul.f32 0.35355338, %v909_v35 }
 0x32a   : > { %v874_v25 = vpop.f32.mrf.mxu3 }
 0x32b   : > { %v917_v26 = vmul.f32 0.35355338, %v874_v25  ;;  %v921_v27 = vsel %vm920_vm11, %v3054_v23, -inf  ;;  %v943_v39 = vsel %vm924_vm12, %v919_v37, -inf }
 0x32c   : > { %922 = vmax.xlane.f32.xlu2 %v921_v27 }
 0x32d   : > { %v937_v28 = vsel %vm924_vm12, %v917_v26, -inf }
 0x32e   : > { %938 = vmax.xlane.f32.xlu1 %v937_v28 }
 0x330   : > { %v804_v30 = vpop.f32.mrf.mxu1 }
 0x331   : > { %v3059_v31 = vmul.f32 0.35355338, %v804_v30 }
 0x333   : > { %v925_v34 = vsel %vm924_vm12, %v3059_v31, -inf }
 0x334   : > { %941 = vmax.xlane.f32.xlu2 %v940_v33  ;;  %926 = vmax.xlane.f32.xlu0 %v925_v34 }
 0x33c   : > { %929 = vmax.xlane.f32.xlu2 %v928_v38  ;;  %944 = vmax.xlane.f32.xlu0 %v943_v39 }
 0x344   : > { %932 = vmax.xlane.f32.xlu0 %v931_v42 }
 0x347   : > { %1120 = vrot.lane.b32.xlu1 %v3008_v3, %s3521_s9 }
 0x354   : > { %2543 = vrot.lane.b32.xlu2 %v2542_v43, %s3521_s9 }
 0x358   : > { %1084 = vrot.lane.b32.xlu0 %v3004_v2, %s3521_s9 }
 0x399   : > { %v936_v45 = vpop.xlane.xlu1 %935 }
 0x39a   : > { %v950_v49 = vsub.f32 %v916_v20, %v936_v45 }
 0x39c   : > { %v962_v51 = vmul.f32 1.442695, %v950_v49 }
 0x39f   : > { %v923_v44 = vpop.xlane.xlu2 %922 }
 0x3a0   : > { %v946_v24 = vsub.f32 %v3054_v23, %v923_v44 }
 0x3a1   : > { %v939_v52 = vpop.xlane.xlu1 %938 }
 0x3a2   : > { %v951_v57 = vsub.f32 %v917_v26, %v939_v52  ;;  %v954_v25 = vmul.f32 1.442695, %v946_v24 }
 0x3a4   : > { %v964_v60 = vmul.f32 1.442695, %v951_v57 }
 0x3a7   : > { %v942_v46 = vpop.xlane.xlu2 %941  ;;  %v927_v47 = vpop.xlane.xlu0 %926 }
 0x3a8   : > { %v952_v48 = vsub.f32 %v918_v29, %v942_v46  ;;  %v947_v26 = vsub.f32 %v3059_v31, %v927_v47 }
 0x3aa   : > { %v966_v50 = vmul.f32 1.442695, %v952_v48  ;;  %v956_v27 = vmul.f32 1.442695, %v947_v26 }
 0x3ac   : > { %2574 = vpow2.f32 %v966_v50 }
 0x3ad   : > { %2576 = vpow2.f32 %v962_v51 }
 0x3af   : > { %v930_v53 = vpop.xlane.xlu2 %929  ;;  %v945_v54 = vpop.xlane.xlu0 %944 }
 0x3b0   : > { %v948_v55 = vsub.f32 %v914_v36, %v930_v53  ;;  %v953_v8 = vsub.f32 %v919_v37, %v945_v54 }
 0x3b2   : > { %v3074_v56 = vpop.eup %2574  ;;  %v958_v58 = vmul.f32 1.442695, %v948_v55  ;;  %v968_v13 = vmul.f32 1.442695, %v953_v8 }
 0x3b3   : > { %v988_v59 = vsel %vm920_vm11, %v3074_v56, 0.0  ;;  %v2577_v1 = vpop.eup %2576 }
 0x3b4   : > { %2578 = vpow2.f32 %v958_v58  ;;  %989 = vadd.xlane.f32.xlu2 %v988_v59  ;;  %v982_v11 = vsel %vm920_vm11, %v2577_v1, 0.0 }
 0x3b5   : > { %2580 = vpow2.f32 %v964_v60 }
 0x3b7   : > { %v2544_v61 = vpop.permute.xlu2 %2543  ;;  %v933_v63 = vpop.xlane.xlu0 %932 }
 0x3b8   : > { %v949_v2 = vsub.f32 %v915_v41, %v933_v63  ;;  %v2545_v3 = vunpack.i.l.bf16 %v2544_v61  ;;  %v2546_v22 = vunpack.i.h.bf16 %v2544_v61  ;;  %v1189_v61 = vld [vmem:[%s3502_s7 + $0x18] sm:$0xff]  ;;  %v1188_v63 = vld [vmem:[%s3502_s7 + $0x10] sm:$0xff] }
 0x3b9   : > { %v1121_v4 = vpop.permute.xlu1 %1120 }
 0x3ba   : > { %v2579_v5 = vpop.eup %2578  ;;  %v960_v10 = vmul.f32 1.442695, %v949_v2  ;;  %1074 = vmatpush.msrb.mxu2 %v2545_v3  ;;  %2413 = vmatpush.msk.msra.mxu0 %vm649_vm0, %v1121_v4  ;;  %v1186_v2 = vld [vmem:[%s3502_s7] sm:$0xff] }
 0x3bb   : > { %v976_v12 = vsel %vm920_vm11, %v2579_v5, 0.0  ;;  %v2581_v14 = vpop.eup %2580 }
 0x3bc   : > { %2582 = vpow2.f32 %v960_v10  ;;  %983 = vadd.xlane.f32.xlu2 %v982_v11  ;;  %977 = vadd.xlane.f32.xlu1 %v976_v12  ;;  %v985_v16 = vsel %vm924_vm12, %v2581_v14, 0.0 }
 0x3bd   : > { %2584 = vpow2.f32 %v968_v13 }
 0x3be   : > { %2586 = vpow2.f32 %v954_v25 }
 0x3bf   : > { %2588 = vpow2.f32 %v956_v27 }
 0x3c2   : > { %v2583_v15 = vpop.eup %2582 }
 0x3c3   : > { %v979_v18 = vsel %vm924_vm12, %v2583_v15, 0.0  ;;  %v2585_v19 = vpop.eup %2584 }
 0x3c4   : > { %986 = vadd.xlane.f32.xlu2 %v985_v16  ;;  %980 = vadd.xlane.f32.xlu0 %v979_v18  ;;  %v991_v21 = vsel %vm924_vm12, %v2585_v19, 0.0  ;;  %v2587_v28 = vpop.eup %2586 }
 0x3c5   : > { %v970_v29 = vsel %vm920_vm11, %v2587_v28, 0.0  ;;  %v2589_v30 = vpop.eup %2588 }
 0x3ca   : > { %v1085_v20 = vpop.permute.xlu0 %1084 }
 0x3cb   : > { %2410 = vmatpush.msk.msrb.mxu3 %vm649_vm0, %v1085_v20 }
 0x3cc   : > { %992 = vadd.xlane.f32.xlu0 %v991_v21  ;;  %v2555_v21 = vld [vmem:[%s3503_s8] ss:$0 sm:$0xff] }
 0x3cd   : > { %1110 = vmatpush.msrb.mxu3 %v2546_v22 }
 0x3d5   : > { %1118 = vrot.lane.b32.xlu1 %v3020_v7, %s3521_s9  ;;  %v973_v7 = vsel %vm924_vm12, %v2589_v30, 0.0 }
 0x3dc   : > { %1012 = vrot.lane.b32.xlu2 %v2993_v0, %s3521_s9 }
 0x3e0   : > { %1010 = vrot.lane.b32.xlu0 %v2987_v62, %s3521_s9  ;;  %s643_s9 = scalar_lea.vmem %s3514_s19, %s3539_s2 }
 0x3ff   : > { %971 = vadd.xlane.f32.xlu1 %v970_v29 }
 0x405   : > { %974 = vadd.xlane.f32.xlu2 %v973_v7 }
 0x427   : > { %v990_v0 = vpop.xlane.xlu2 %989 }
 0x42f   : > { %v978_v32 = vpop.xlane.xlu1 %977  ;;  %v984_v33 = vpop.xlane.xlu2 %983 }
 0x430   : > { %2590 = vrcp.f32 %v978_v32 }
 0x431   : > { %2592 = vrcp.f32 %v984_v33 }
 0x436   : > { %v2591_v62 = vpop.eup %2590 }
 0x437   : > { %v2593_v23 = vpop.eup %2592  ;;  %v987_v34 = vpop.xlane.xlu2 %986  ;;  %v1004_v35 = vmul.f32 %v2591_v62, %v2579_v5 }
 0x438   : > { %v981_v31 = vpop.xlane.xlu0 %980  ;;  %2594 = vrcp.f32 %v987_v34  ;;  %v1006_v36 = vmul.f32 %v2593_v23, %v2577_v1  ;;  %v1187_v1 = vld [vmem:[%s3502_s7 + $0x8] sm:$0xff] }
 0x439   : > { %2596 = vrcp.f32 %v981_v31  ;;  %2408 = vmatmul.msk.f32.vlgmr.msrb.gmra.mxu2 %vm920_vm11, %v1004_v35  ;;  %v1284_v35 = vld [vmem:[%s3506_s11 + $0x18] sm:$0xff] }
 0x43a   : > { %2411 = vmatmul.msk.f32.vlgmr.msrb.gmra.mxu3 %vm920_vm11, %v1006_v36  ;;  %2598 = vrcp.f32 %v990_v0  ;;  %1307 = vmatpush.msra.mxu2 %v1284_v35  ;;  %v1283_v36 = vld [vmem:[%s3506_s11 + $0x10] sm:$0xff]  ;;  %v1406_v35 = vld [vmem:[%s3508_s13] sm:$0xff] }
 0x43c   : > { %1308 = vmatpush.msra.mxu2 %v1283_v36 }
 0x43e   : > { %v2595_v37 = vpop.eup %2594 }
 0x43f   : > { %v2597_v38 = vpop.eup %2596  ;;  %v1013_v39 = vpop.permute.xlu2 %1012  ;;  %v1007_v40 = vmul.f32 %v2595_v37, %v2581_v14  ;;  %v1282_v37 = vld [vmem:[%s3506_s11 + $0x8] sm:$0xff] }
 0x440   : > { %2404 = vmatpush.msk.msrb.mxu1 %vm649_vm0, %v1013_v39  ;;  %v1005_v41 = vmul.f32 %v2597_v38, %v2583_v15  ;;  %v993_v42 = vpop.xlane.xlu0 %992  ;;  %v2599_v43 = vpop.eup %2598  ;;  %1309 = vmatpush.msra.mxu2 %v1282_v37  ;;  %v1281_v38 = vld [vmem:[%s3506_s11] sm:$0xff] }
 0x441   : > { %2600 = vrcp.f32 %v993_v42  ;;  %v1008_v44 = vmul.f32 %v2599_v43, %v3074_v56 }
 0x442   : > { %2409 = vmatmul.msk.f32.gmra.mxu2 %vm920_vm11, %v1005_v41  ;;  %2412 = vmatmul.msk.f32.gmra.mxu3 %vm920_vm11, %v1007_v40 }
 0x443   : > { %1310 = vmatpush.msra.mxu2 %v1281_v38 }
 0x447   : > { %v1119_v45 = vpop.permute.xlu1 %1118  ;;  %v2601_v46 = vpop.eup %2600 }
 0x448   : > { %1146 = vmatpush.msra.mxu0 %v1119_v45  ;;  %v1009_v47 = vmul.f32 %v2601_v46, %v2585_v19 }
 0x449   : > { %2414 = vmatmul.msk.f32.vlgmr.msra.gmra.mxu0 %vm920_vm11, %v1008_v44 }
 0x451   : > { %2415 = vmatmul.msk.f32.gmra.mxu0 %vm920_vm11, %v1009_v47 }
 0x452   : > { %v1011_v48 = vpop.permute.xlu0 %1010 }
 0x453   : > { %1038 = vmatpush.msrb.mxu1 %v1011_v48 }
 0x455   : > { %1212 = vmatpush.msra.mxu1 %v1189_v61 }
 0x457   : > { %1213 = vmatpush.msra.mxu1 %v1188_v63 }
 0x459   : > { %1214 = vmatpush.msra.mxu1 %v1187_v1 }
 0x45b   : > { %1215 = vmatpush.msra.mxu1 %v1186_v2 }
 0x472   : > { %v972_v49 = vpop.xlane.xlu1 %971 }
 0x473   : > { %2602 = vrcp.f32 %v972_v49 }
 0x478   : > { %v975_v50 = vpop.xlane.xlu2 %974 }
 0x479   : > { %v2603_v51 = vpop.eup %2602  ;;  %2604 = vrcp.f32 %v975_v50 }
 0x47a   : > { %v1002_v52 = vmul.f32 %v2603_v51, %v2587_v28  ;;  %v2556_v51 = vld [vmem:[#allocation5] ss:$0 sm:$0xff] }
 0x47c   : > { %2405 = vmatmul.msk.f32.vlgmr.msrb.gmra.mxu1 %vm920_vm11, %v1002_v52 }
 0x47f   : > { %v2605_v53 = vpop.eup %2604 }
 0x480   : > { %v1003_v54 = vmul.f32 %v2605_v53, %v2589_v30 }
 0x484   : > { %2406 = vmatmul.msk.f32.gmra.mxu1 %vm920_vm11, %v1003_v54  ;;  %v2557_v54 = vld [vmem:[%s3505_s10] ss:$0 sm:$0xff] }
 0x4bc   : > { %v1076_v55 = vpop.f32.mrf.mxu2 }
 0x4bd   : > { %v1112_v56 = vpop.f32.mrf.mxu3  ;;  %1156 = vrot.lane.b32.xlu1 %v1076_v55, %s3519_s22 }
 0x4be   : > { %1164 = vrot.lane.b32.xlu0 %v1112_v56, %s3517_s18 }
 0x4c5   : > { %v1079_v57 = vpop.f32.mrf.mxu2  ;;  %v1115_v58 = vpop.f32.mrf.mxu3 }
 0x4c6   : > { %1166 = vrot.lane.b32.xlu1 %v1115_v58, %s3517_s18  ;;  %1158 = vrot.lane.b32.xlu0 %v1079_v57, %s3519_s22  ;;  %v1148_v59 = vpop.f32.mrf.mxu0 }
 0x4c7   : > { %1172 = vrot.lane.b32.xlu2 %v1148_v59, %s2779_s24 }
 0x4ce   : > { %v1151_v60 = vpop.f32.mrf.mxu0 }
 0x4cf   : > { %1174 = vrot.lane.b32.xlu0 %v1151_v60, %s2779_s24 }
 0x4f9   : > { %v1040_v3 = vpop.f32.mrf.mxu1 }
 0x501   : > { %v1043_v14 = vpop.f32.mrf.mxu1 }
 0x521   : > { %v1173_v10 = vpop.permute.xlu2 %1172 }
 0x52f   : > { %v1157_v4 = vpop.permute.xlu1 %1156 }
 0x530   : > { %v1178_v5 = vsel %vm775_vm10, %v1040_v3, %v1157_v4  ;;  %v1165_v8 = vpop.permute.xlu0 %1164 }
 0x531   : > { %v1181_v11 = vsel %vm1180_vm13, %v1178_v5, %v1165_v8  ;;  %v2558_v5 = vld [vmem:[%s3507_s12] ss:$0 sm:$0xff] }
 0x532   : > { %v1184_v12 = vsel %vm1183_vm14, %v1181_v11, %v1173_v10 }
 0x533   : > { %2416 = vmatmul.msk.f32.vlgmr.msra.gmra.mxu1 %vm657_vm1, %v1184_v12 }
 0x538   : > { %v1159_v13 = vpop.permute.xlu0 %1158  ;;  %v1167_v15 = vpop.permute.xlu1 %1166 }
 0x539   : > { %v1179_v16 = vsel %vm775_vm10, %v1043_v14, %v1159_v13  ;;  %v1413_v14 = vld [vmem:[%s3508_s13 + $0x38] sm:$0xff] }
 0x53a   : > { %v1182_v19 = vsel %vm1180_vm13, %v1179_v16, %v1167_v15  ;;  %1433 = vmatpush.msra.mxu3 %v1413_v14 }
 0x541   : > { %v1175_v18 = vpop.permute.xlu0 %1174 }
 0x542   : > { %v1185_v20 = vsel %vm1183_vm14, %v1182_v19, %v1175_v18  ;;  %v1412_v18 = vld [vmem:[%s3508_s13 + $0x30] sm:$0xff] }
 0x543   : > { %2417 = vmatmul.msk.f32.gmra.mxu1 %vm657_vm1, %v1185_v20  ;;  %1434 = vmatpush.msra.mxu3 %v1412_v18 }
 0x5b0   : > { %v1217_v22 = vpop.f32.mrf.mxu1 }
 0x5b1   : > { %v1218_v24 = vadd.f32 %v2555_v21, %v1217_v22 }
 0x5b3   : > { %v3135_v25 = vadd.f32 %v1218_v24, %v2943_v6 }
 0x5b5   : > { %v1227_v26 = vsel %vm657_vm1, %v3135_v25, 0.0 }
 0x5b6   : > { %1228 = vadd.xlane.f32.xlu1 %v1227_v26  ;;  %v1410_v26 = vld [vmem:[%s3508_s13 + $0x20] sm:$0xff] }
 0x5c0   : > { %v1220_v27 = vpop.f32.mrf.mxu1 }
 0x5c1   : > { %v1221_v28 = vadd.f32 %v2555_v21, %v1220_v27  ;;  %v1411_v21 = vld [vmem:[%s3508_s13 + $0x28] sm:$0xff] }
 0x5c2   : > { %1435 = vmatpush.msra.mxu3 %v1411_v21 }
 0x5c3   : > { %v3140_v29 = vadd.f32 %v1221_v28, %v2950_v9 }
 0x5c4   : > { %1436 = vmatpush.msra.mxu3 %v1410_v26 }
 0x5c5   : > { %v1230_v30 = vsel %vm661_vm2, %v3140_v29, 0.0 }
 0x5c6   : > { %1231 = vadd.xlane.f32.xlu0 %v1230_v30 }
 0x629   : > { %v1229_v7 = vpop.xlane.xlu1 %1228 }
 0x62a   : > { %v1233_v0 = vmul.f32 %v1229_v7, %v2954_v17  ;;  %v1409_v7 = vld [vmem:[%s3508_s13 + $0x18] sm:$0xff] }
 0x62b   : > { %1437 = vmatpush.msra.mxu3 %v1409_v7 }
 0x62c   : > { %v1235_v32 = vsub.f32 %v3135_v25, %v1233_v0 }
 0x62e   : > { %v1237_v6 = vmul.f32 %v1235_v32, %v1235_v32 }
 0x630   : > { %v1239_v33 = vsel %vm657_vm1, %v1237_v6, 0.0  ;;  %v1408_v6 = vld [vmem:[%s3508_s13 + $0x10] sm:$0xff] }
 0x631   : > { %1240 = vadd.xlane.f32.xlu2 %v1239_v33  ;;  %1438 = vmatpush.msra.mxu3 %v1408_v6 }
 0x639   : > { %v1232_v62 = vpop.xlane.xlu0 %1231 }
 0x63a   : > { %v1234_v23 = vmul.f32 %v1232_v62, %v2954_v17 }
 0x63c   : > { %v1236_v34 = vsub.f32 %v3140_v29, %v1234_v23 }
 0x63e   : > { %v1238_v9 = vmul.f32 %v1236_v34, %v1236_v34 }
 0x640   : > { %v1242_v31 = vsel %vm661_vm2, %v1238_v9, 0.0 }
 0x641   : > { %1243 = vadd.xlane.f32.xlu1 %v1242_v31 }
 0x6a4   : > { %v1241_v39 = vpop.xlane.xlu2 %1240 }
 0x6a5   : > { %v1245_v40 = vmul.f32 %v1241_v39, %v2954_v17 }
 0x6a7   : > { %v1247_v41 = vadd.f32 1e-05, %v1245_v40 }
 0x6a9   : > { %2606 = vrsqrt.f32 %v1247_v41  ;;  %vm1255_vm3 = vweird.f32 %v1247_v41 }
 0x6af   : > { %v2607_v42 = vpop.eup %2606 }
 0x6b0   : > { %v1250_v43 = vmul.f32 %v2607_v42, %v1247_v41  ;;  %vm1256_vm15 = vweird.f32 %v2607_v42 }
 0x6b1   : > { %vm1257_vm4 = vmor %vm1255_vm3, %vm1256_vm15 }
 0x6b2   : > { %v1251_v44 = vmul.f32 %v2607_v42, %v1250_v43 }
 0x6b4   : > { %v1252_v45 = vmul.f32 0.5, %v1251_v44  ;;  %v1244_v46 = vpop.xlane.xlu1 %1243 }
 0x6b5   : > { %v1246_v47 = vmul.f32 %v1244_v46, %v2954_v17 }
 0x6b6   : > { %v1253_v48 = vsub.f32 1.5, %v1252_v45 }
 0x6b7   : > { %v1248_v49 = vadd.f32 1e-05, %v1246_v47 }
 0x6b8   : > { %v1254_v50 = vmul.f32 %v2607_v42, %v1253_v48 }
 0x6b9   : > { %2608 = vrsqrt.f32 %v1248_v49  ;;  %vm1265_vm6 = vweird.f32 %v1248_v49 }
 0x6ba   : > { %v1258_v52 = vsel %vm1257_vm4, %v2607_v42, %v1254_v50  ;;  %vm1418_vm4 = vcmask 523264  }
 0x6bb   : > { %v1269_v53 = vmul.f32 %v1258_v52, %v1235_v32 }
 0x6bd   : > { %v1274_v55 = vmul.f32 %v2556_v51, %v1269_v53 }
 0x6bf   : > { %v2609_v56 = vpop.eup %2608  ;;  %v1279_v57 = vadd.f32 %v2557_v54, %v1274_v55 }
 0x6c0   : > { %v1260_v58 = vmul.f32 %v2609_v56, %v1248_v49  ;;  %vm1266_vm5 = vweird.f32 %v2609_v56 }
 0x6c1   : > { %2418 = vmatmul.msk.f32.vlgmr.msra.gmra.mxu2 %vm657_vm1, %v1279_v57  ;;  %vm1267_vm7 = vmor %vm1265_vm6, %vm1266_vm5 }
 0x6c2   : > { %v1261_v59 = vmul.f32 %v2609_v56, %v1260_v58 }
 0x6c4   : > { %v1262_v60 = vmul.f32 0.5, %v1261_v59 }
 0x6c6   : > { %v1263_v61 = vsub.f32 1.5, %v1262_v60 }
 0x6c8   : > { %v1264_v63 = vmul.f32 %v2609_v56, %v1263_v61 }
 0x6ca   : > { %v1268_v1 = vsel %vm1267_vm7, %v2609_v56, %v1264_v63 }
 0x6cb   : > { %v1270_v2 = vmul.f32 %v1268_v1, %v1236_v34  ;;  %v1407_v34 = vld [vmem:[%s3508_s13 + $0x8] sm:$0xff] }
 0x6cc   : > { %1439 = vmatpush.msra.mxu3 %v1407_v34 }
 0x6cd   : > { %v1275_v3 = vmul.f32 %v2556_v51, %v1270_v2 }
 0x6ce   : > { %1440 = vmatpush.msra.mxu3 %v1406_v35 }
 0x6cf   : > { %v1280_v4 = vadd.f32 %v2557_v54, %v1275_v3 }
 0x6d1   : > { %2419 = vmatmul.msk.f32.gmra.mxu2 %vm657_vm1, %v1280_v4 }
 0x744   : > { %v1312_v8 = vpop.f32.mrf.mxu2 }
 0x745   : > { %v3172_v10 = vadd.f32 %v2558_v5, %v1312_v8 }
 0x747   : > { %v3175_v11 = vmul.f32 0.70710677, %v3172_v10 }
 0x749   : > { %v1322_v12 = vmul.f32 %v3175_v11, %v3175_v11 }
 0x74b   : > { %v1323_v13 = vmin.f32 %v1322_v12, 16.0 }
 0x74d   : > { %v1324_v15 = vmul.f32 2.1237322e-06, %v1323_v13  ;;  %v1335_v16 = vmul.f32 3.8918573e-05, %v1323_v13 }
 0x74f   : > { %v1325_v19 = vadd.f32 0.00028619796, %v1324_v15  ;;  %v1336_v20 = vadd.f32 0.001143296, %v1335_v16 }
 0x751   : > { %v1326_v22 = vmul.f32 %v1325_v19, %v1323_v13  ;;  %v1337_v24 = vmul.f32 %v1336_v20, %v1323_v13  ;;  %v1318_v20 = vmul.f32 0.5, %v3172_v10 }
 0x753   : > { %v1327_v27 = vadd.f32 0.0036580483, %v1326_v22  ;;  %v1338_v28 = vadd.f32 0.014752088, %v1337_v24 }
 0x754   : > { %v1315_v30 = vpop.f32.mrf.mxu2 }
 0x755   : > { %v1339_v0 = vmul.f32 %v1338_v28, %v1323_v13  ;;  %v3194_v32 = vadd.f32 %v2558_v5, %v1315_v30  ;;  %v1328_v33 = vmul.f32 %v1327_v27, %v1323_v13 }
 0x757   : > { %v1340_v62 = vadd.f32 0.112945676, %v1339_v0  ;;  %v3200_v23 = vmul.f32 0.70710677, %v3194_v32  ;;  %v1329_v36 = vadd.f32 0.05243302, %v1328_v33 }
 0x758   : > { %v1319_v35 = vmul.f32 0.5, %v3194_v32 }
 0x759   : > { %v1341_v9 = vmul.f32 %v1340_v62, %v1323_v13  ;;  %v1362_v31 = vmul.f32 %v3200_v23, %v3200_v23  ;;  %v1330_v42 = vmul.f32 %v1329_v36, %v1323_v13 }
 0x75b   : > { %v1342_v37 = vadd.f32 0.4994258, %v1341_v9  ;;  %v1363_v38 = vmin.f32 %v1362_v31, 16.0  ;;  %v1331_v48 = vadd.f32 0.18741608, %v1330_v42 }
 0x75d   : > { %v1343_v39 = vmul.f32 %v1342_v37, %v1323_v13  ;;  %v1364_v40 = vmul.f32 2.1237322e-06, %v1363_v38  ;;  %v1375_v41 = vmul.f32 3.8918573e-05, %v1363_v38  ;;  %v1332_v53 = vmul.f32 %v1331_v48, %v1323_v13 }
 0x75f   : > { %v1344_v43 = vadd.f32 1.0, %v1343_v39  ;;  %v1365_v44 = vadd.f32 0.00028619796, %v1364_v40  ;;  %v1376_v45 = vadd.f32 0.001143296, %v1375_v41 }
 0x760   : > { %v1333_v59 = vadd.f32 1.1283791, %v1332_v53  ;;  %v2429_v53 = vld [vmem:[%s3500_s5 + $0x38] sm:$0xff] }
 0x761   : > { %2610 = vrcp.f32 %v1344_v43  ;;  %v1366_v46 = vmul.f32 %v1365_v44, %v1363_v38  ;;  %v1377_v47 = vmul.f32 %v1376_v45, %v1363_v38  ;;  %v1356_v60 = vand.u32 2147483648, %v1344_v43  ;;  %1536 = vmatpush.msrb.mxu0 %v2429_v53 }
 0x762   : > { %v1354_v63 = vand.u32 2147483647, %v1344_v43  ;;  %vm1350_vm9 = vweird.f32 %v1344_v43  ;;  %v1334_v8 = vmul.f32 %v1333_v59, %v3175_v11 }
 0x763   : > { %v1378_v49 = vadd.f32 0.014752088, %v1377_v47  ;;  %v1367_v50 = vadd.f32 0.0036580483, %v1366_v46  ;;  %v1357_v5 = vor.u32 1.1754944e-38, %v1356_v60 }
 0x764   : > { %vm1355_vm3 = vcmp.eq.f32.partialorder %v1354_v63, 8.507059e+37 }
 0x765   : > { %v1379_v51 = vmul.f32 %v1378_v49, %v1363_v38  ;;  %v1368_v56 = vmul.f32 %v1367_v50, %v1363_v38 }
 0x767   : > { %v2611_v52 = vpop.eup %2610  ;;  %v1380_v55 = vadd.f32 0.112945676, %v1379_v51  ;;  %v1369_v2 = vadd.f32 0.05243302, %v1368_v56  ;;  %v2426_v56 = vld [vmem:[%s3500_s5 + $0x20] sm:$0xff] }
 0x768   : > { %v1346_v54 = vmul.f32 %v2611_v52, %v1344_v43  ;;  %vm1351_vm8 = vweird.f32 %v2611_v52 }
 0x769   : > { %v1381_v58 = vmul.f32 %v1380_v55, %v1363_v38  ;;  %vm1352_vm15 = vmor %vm1350_vm9, %vm1351_vm8  ;;  %v1370_v15 = vmul.f32 %v1369_v2, %v1363_v38  ;;  %v2427_v55 = vld [vmem:[%s3500_s5 + $0x28] sm:$0xff] }
 0x76a   : > { %v1347_v57 = vsub.f32 1.0, %v1346_v54  ;;  %v2428_v54 = vld [vmem:[%s3500_s5 + $0x30] sm:$0xff] }
 0x76b   : > { %v1382_v1 = vadd.f32 0.4994258, %v1381_v58  ;;  %v1371_v19 = vadd.f32 0.18741608, %v1370_v15  ;;  %1537 = vmatpush.msrb.mxu0 %v2428_v54  ;;  %v2561_v15 = vld [vmem:[%s3499_s4 + $0x1] ss:$0 sm:$0xff] }
 0x76c   : > { %v1348_v61 = vmul.f32 %v2611_v52, %v1347_v57 }
 0x76d   : > { %v1383_v4 = vmul.f32 %v1382_v1, %v1363_v38  ;;  %v1372_v26 = vmul.f32 %v1371_v19, %v1363_v38  ;;  %v2559_v38 = vld [vmem:[%s3509_s14] ss:$0 sm:$0xff]  ;;  %1538 = vmatpush.msrb.mxu0 %v2427_v55 }
 0x76e   : > { %v1349_v3 = vadd.f32 %v2611_v52, %v1348_v61 }
 0x76f   : > { %v1384_v13 = vadd.f32 1.0, %v1383_v4  ;;  %v1373_v30 = vadd.f32 1.1283791, %v1372_v26  ;;  %1539 = vmatpush.msrb.mxu0 %v2426_v56 }
 0x770   : > { %v1353_v12 = vsel %vm1352_vm15, %v2611_v52, %v1349_v3 }
 0x771   : > { %v1358_v14 = vsel %vm1355_vm3, %v1357_v5, %v1353_v12  ;;  %2612 = vrcp.f32 %v1384_v13  ;;  %v1396_v28 = vand.u32 2147483648, %v1384_v13  ;;  %v1394_v0 = vand.u32 2147483647, %v1384_v13  ;;  %v2560_v12 = vld [vmem:[%s3534_s27 + $0x1] ss:$0 sm:$0xff] }
 0x772   : > { %v1359_v16 = vmul.f32 %v1358_v14, %v1334_v8  ;;  %vm1390_vm6 = vweird.f32 %v1384_v13  ;;  %v1374_v10 = vmul.f32 %v1373_v30, %v3200_v23 }
 0x773   : > { %v1397_v33 = vor.u32 1.1754944e-38, %v1396_v28  ;;  %vm1395_vm8 = vcmp.eq.f32.partialorder %v1394_v0, 8.507059e+37 }
 0x774   : > { %v2420_v18 = vclamps-f32 %v1359_v16, 1.0 }
 0x776   : > { %v1402_v21 = vadd.f32 1.0, %v2420_v18 }
 0x777   : > { %v2613_v22 = vpop.eup %2612 }
 0x778   : > { %v1404_v24 = vmul.f32 %v1402_v21, %v1318_v20  ;;  %v1386_v27 = vmul.f32 %v2613_v22, %v1384_v13  ;;  %vm1391_vm5 = vweird.f32 %v2613_v22 }
 0x779   : > { %vm1392_vm7 = vmor %vm1390_vm6, %vm1391_vm5 }
 0x77a   : > { %2422 = vmatmul.msk.f32.vlgmr.msra.gmra.mxu3 %vm1418_vm4, %v1404_v24  ;;  %v1387_v11 = vsub.f32 1.0, %v1386_v27 }
 0x77c   : > { %v1388_v7 = vmul.f32 %v2613_v22, %v1387_v11 }
 0x77e   : > { %v1389_v6 = vadd.f32 %v2613_v22, %v1388_v7  ;;  %v2562_v7 = vld [vmem:[%s3501_s6 + $0x1] ss:$0 sm:$0xff] }
 0x780   : > { %v1393_v62 = vsel %vm1392_vm7, %v2613_v22, %v1389_v6 }
 0x781   : > { %v1398_v34 = vsel %vm1395_vm8, %v1397_v33, %v1393_v62 }
 0x782   : > { %v1399_v9 = vmul.f32 %v1398_v34, %v1374_v10 }
 0x784   : > { %v2421_v31 = vclamps-f32 %v1399_v9, 1.0 }
 0x786   : > { %v1403_v36 = vadd.f32 1.0, %v2421_v31 }
 0x788   : > { %v1405_v37 = vmul.f32 %v1403_v36, %v1319_v35 }
 0x78a   : > { %2423 = vmatmul.msk.f32.gmra.mxu3 %vm1418_vm4, %v1405_v37 }
 0x7fd   : > { %v1442_v39 = vpop.f32.mrf.mxu3 }
 0x7fe   : > { %v1443_v40 = vadd.f32 %v2559_v38, %v1442_v39 }
 0x800   : > { %v3220_v41 = vadd.f32 %v1443_v40, %v3135_v25 }
 0x802   : > { %v1454_v23 = vsel %vm657_vm1, %v3220_v41, 0.0 }
 0x803   : > { %1455 = vadd.xlane.f32.xlu0 %v1454_v23 }
 0x80d   : > { %v1445_v42 = vpop.f32.mrf.mxu3 }
 0x80e   : > { %v1446_v43 = vadd.f32 %v2559_v38, %v1445_v42 }
 0x810   : > { %v3225_v32 = vadd.f32 %v1446_v43, %v3140_v29 }
 0x812   : > { %v1457_v44 = vsel %vm661_vm2, %v3225_v32, 0.0 }
 0x813   : > { %1458 = vadd.xlane.f32.xlu2 %v1457_v44 }
 0x876   : > { %v1456_v45 = vpop.xlane.xlu0 %1455 }
 0x877   : > { %v1460_v46 = vmul.f32 %v1456_v45, %v2954_v17 }
 0x879   : > { %v1462_v47 = vsub.f32 %v3220_v41, %v1460_v46 }
 0x87b   : > { %v1464_v25 = vmul.f32 %v1462_v47, %v1462_v47 }
 0x87d   : > { %v1466_v48 = vsel %vm657_vm1, %v1464_v25, 0.0 }
 0x87e   : > { %1467 = vadd.xlane.f32.xlu1 %v1466_v48 }
 0x886   : > { %v1459_v49 = vpop.xlane.xlu2 %1458 }
 0x887   : > { %v1461_v50 = vmul.f32 %v1459_v49, %v2954_v17 }
 0x889   : > { %v1463_v51 = vsub.f32 %v3225_v32, %v1461_v50 }
 0x88b   : > { %v1465_v29 = vmul.f32 %v1463_v51, %v1463_v51 }
 0x88d   : > { %v1469_v52 = vsel %vm661_vm2, %v1465_v29, 0.0 }
 0x88e   : > { %1470 = vadd.xlane.f32.xlu0 %v1469_v52 }
 0x8f1   : > { %v1468_v57 = vpop.xlane.xlu1 %1467 }
 0x8f2   : > { %v1472_v58 = vmul.f32 %v1468_v57, %v2954_v17 }
 0x8f4   : > { %v1474_v59 = vadd.f32 1e-05, %v1472_v58 }
 0x8f6   : > { %2614 = vrsqrt.f32 %v1474_v59  ;;  %vm1482_vm15 = vweird.f32 %v1474_v59 }
 0x8fc   : > { %v2615_v60 = vpop.eup %2614 }
 0x8fd   : > { %v1477_v61 = vmul.f32 %v2615_v60, %v1474_v59  ;;  %vm1483_vm9 = vweird.f32 %v2615_v60 }
 0x8fe   : > { %vm1484_vm3 = vmor %vm1482_vm15, %vm1483_vm9 }
 0x8ff   : > { %v1478_v63 = vmul.f32 %v2615_v60, %v1477_v61 }
 0x901   : > { %v1479_v1 = vmul.f32 0.5, %v1478_v63  ;;  %v1471_v2 = vpop.xlane.xlu0 %1470 }
 0x902   : > { %v1473_v4 = vmul.f32 %v1471_v2, %v2954_v17 }
 0x903   : > { %v1480_v3 = vsub.f32 1.5, %v1479_v1 }
 0x904   : > { %v1475_v8 = vadd.f32 1e-05, %v1473_v4 }
 0x905   : > { %v1481_v5 = vmul.f32 %v2615_v60, %v1480_v3 }
 0x906   : > { %2616 = vrsqrt.f32 %v1475_v8  ;;  %vm1492_vm6 = vweird.f32 %v1475_v8 }
 0x907   : > { %v1485_v13 = vsel %vm1484_vm3, %v2615_v60, %v1481_v5 }
 0x908   : > { %v1496_v14 = vmul.f32 %v1485_v13, %v1462_v47 }
 0x90a   : > { %v1501_v16 = vmul.f32 %v2560_v12, %v1496_v14 }
 0x90c   : > { %v1506_v18 = vadd.f32 %v2561_v15, %v1501_v16  ;;  %v2617_v19 = vpop.eup %2616 }
 0x90d   : > { %v1487_v20 = vmul.f32 %v2617_v19, %v1475_v8  ;;  %vm1493_vm5 = vweird.f32 %v2617_v19 }
 0x90e   : > { %2431 = vmatmul.msk.f32.vlgmr.msrb.gmra.mxu0 %vm657_vm1, %v1506_v18  ;;  %vm1494_vm7 = vmor %vm1492_vm6, %vm1493_vm5 }
 0x90f   : > { %v1488_v21 = vmul.f32 %v2617_v19, %v1487_v20 }
 0x911   : > { %v1489_v22 = vmul.f32 0.5, %v1488_v21 }
 0x913   : > { %v1490_v24 = vsub.f32 1.5, %v1489_v22 }
 0x915   : > { %v1491_v26 = vmul.f32 %v2617_v19, %v1490_v24 }
 0x917   : > { %v1495_v27 = vsel %vm1494_vm7, %v2617_v19, %v1491_v26 }
 0x918   : > { %v1497_v11 = vmul.f32 %v1495_v27, %v1463_v51 }
 0x91a   : > { %v1502_v28 = vmul.f32 %v2560_v12, %v1497_v11 }
 0x91c   : > { %v1507_v30 = vadd.f32 %v2561_v15, %v1502_v28 }
 0x91e   : > { %2432 = vmatmul.msk.f32.gmra.mxu0 %vm657_vm1, %v1507_v30 }
 0x98b   : > { %v1541_v0 = vpop.f32.mrf.mxu0 }
 0x98c   : > { %v3260_v6 = vadd.f32 %v2562_v7, %v1541_v0 }
 0x98e   : > { %1549 = vrot.lane.b32.xlu0 %v3260_v6, %s2772_s1 }
 0x99b   : > { %v1544_v33 = vpop.f32.mrf.mxu0 }
 0x99c   : > { %v3264_v10 = vadd.f32 %v2562_v7, %v1544_v33 }
 0x99e   : > { %1559 = vrot.lane.b32.xlu0 %v3264_v10, %s2774_s25  ;;  %1555 = vrot.lane.b32.xlu1 %v3264_v10, %s2773_s23 }
 0x99f   : > { %1551 = vrot.lane.b32.xlu2 %v3264_v10, %s2772_s1  ;;  %s3535_s1 = smov 64  }
 0x9a6   : > { %1557 = vrot.lane.b32.xlu1 %v3260_v6, %s2774_s25  ;;  %s3537_s25 = smov 16  }
 0x9a7   : > { %1553 = vrot.lane.b32.xlu2 %v3260_v6, %s2773_s23  ;;  %s3536_s23 = smov 8  }
 0x9f9   : > { %v1552_v62 = vpop.permute.xlu2 %1551 }
 0x9fa   : > { %1598 = vrot.lane.b32.xlu2 %v1552_v62, %s2775_s3 }
 0xa00   : > { %v3277_v34 = vpop.permute.xlu0 %1549 }
 0xa01   : > { %1596 = vrot.lane.b32.xlu1 %v3277_v34, %s2775_s3  ;;  %v3281_v9 = vpop.permute.xlu2 %1553 }
 0xa02   : > { %1631 = vrot.lane.b32.xlu2 %v3281_v9, %s2775_s3  ;;  %v2547_v16 = vpack.i.bf16 %v3281_v9, %v3277_v34 }
 0xa0a   : > { %1563 = vrot.lane.b32.xlu2 %v3264_v10, %s2775_s3 }
 0xa10   : > { %v1556_v31 = vpop.permute.xlu1 %1555  ;;  %v3288_v35 = vpop.permute.xlu0 %1559 }
 0xa11   : > { %1633 = vrot.lane.b32.xlu0 %v1556_v31, %s2775_s3 }
 0xa18   : > { %v1558_v36 = vpop.permute.xlu1 %1557 }
 0xa19   : > { %1666 = vrot.lane.b32.xlu1 %v1558_v36, %s2775_s3  ;;  %1668 = vrot.lane.b32.xlu0 %v3288_v35, %s2775_s3 }
 0xa21   : > { %1561 = vrot.lane.b32.xlu0 %v3260_v6, %s2775_s3 }
 0xa54   : > { %v1599_v37 = vpop.permute.xlu2 %1598 }
 0xa55   : > { %2437 = vmatpush.xpose.msk.msrb.mxu2 %vm775_vm10, %v1599_v37 }
 0xa5c   : > { %v1632_v38 = vpop.permute.xlu2 %1631 }
 0xa64   : > { %v1564_v39 = vpop.permute.xlu2 %1563 }
 0xa65   : > { %2433 = vmatpush.xpose.msk.msrb.mxu1 %vm775_vm10, %v1564_v39 }
 0xa73   : > { %v1597_v40 = vpop.permute.xlu1 %1596 }
 0xa74   : > { %2438 = vmatpush.xpose.msk.msrb.mxu2 %vm775_vm10, %v1597_v40 }
 0xa77   : > { %2439 = vmatmul.msk.f32.vlgmr.msrb.gmra.mxu2 %vm775_vm10, %v3277_v34 }
 0xa7f   : > { %2440 = vmatmul.msk.f32.gmra.mxu2 %vm775_vm10, %v1552_v62 }
 0xa83   : > { %v1634_v23 = vpop.permute.xlu0 %1633 }
 0xa84   : > { %2441 = vmatpush.xpose.msk.msrb.mxu3 %vm775_vm10, %v1634_v23 }
 0xa88   : > { %2442 = vmatpush.xpose.msk.msrb.mxu3 %vm775_vm10, %v1632_v38 }
 0xa8b   : > { %2443 = vmatmul.msk.f32.vlgmr.msrb.gmra.mxu3 %vm775_vm10, %v3281_v9  ;;  %v1669_v42 = vpop.permute.xlu0 %1668  ;;  %v1667_v43 = vpop.permute.xlu1 %1666 }
 0xa8c   : > { %2445 = vmatpush.xpose.msk.msra.mxu0 %vm775_vm10, %v1669_v42 }
 0xa90   : > { %2446 = vmatpush.xpose.msk.msra.mxu0 %vm775_vm10, %v1667_v43 }
 0xa93   : > { %2444 = vmatmul.msk.f32.gmra.mxu3 %vm775_vm10, %v1556_v31  ;;  %2447 = vmatmul.msk.f32.vlgmr.msra.gmra.mxu0 %vm775_vm10, %v1558_v36  ;;  %v1562_v44 = vpop.permute.xlu0 %1561 }
 0xa94   : > { %2434 = vmatpush.xpose.msk.msrb.mxu1 %vm775_vm10, %v1562_v44 }
 0xa97   : > { %2435 = vmatmul.msk.f32.vlgmr.msrb.gmra.mxu1 %vm775_vm10, %v3260_v6 }
 0xa9b   : > { %2448 = vmatmul.msk.f32.gmra.mxu0 %vm775_vm10, %v3288_v35 }
 0xa9f   : > { %2436 = vmatmul.msk.f32.gmra.mxu1 %vm775_vm10, %v3264_v10 }
 0xafa   : > { %v1625_v45 = vpop.f32.mrf.mxu2 }
 0xafb   : > { %v1703_v46 = vmul.f32 0.35355338, %v1625_v45 }
 0xafd   : > { %v1715_v47 = vsel %vm920_vm11, %v1703_v46, -inf }
 0xafe   : > { %1716 = vmax.xlane.f32.xlu1 %v1715_v47 }
 0xb02   : > { %v1628_v47 = vpop.f32.mrf.mxu2 }
 0xb0e   : > { %v1660_v25 = vpop.f32.mrf.mxu3 }
 0xb0f   : > { %v1705_v48 = vmul.f32 0.35355338, %v1660_v25 }
 0xb10   : > { %v1695_v49 = vpop.f32.mrf.mxu0 }
 0xb11   : > { %v1707_v50 = vmul.f32 0.35355338, %v1695_v49  ;;  %v1721_v51 = vsel %vm920_vm11, %v1705_v48, -inf }
 0xb12   : > { %1722 = vmax.xlane.f32.xlu2 %v1721_v51 }
 0xb13   : > { %v1727_v29 = vsel %vm920_vm11, %v1707_v50, -inf }
 0xb14   : > { %1728 = vmax.xlane.f32.xlu0 %v1727_v29  ;;  %v1590_v52 = vpop.f32.mrf.mxu1 }
 0xb15   : > { %v1701_v53 = vmul.f32 0.35355338, %v1590_v52  ;;  %v1704_v52 = vmul.f32 0.35355338, %v1628_v47 }
 0xb16   : > { %v1663_v25 = vpop.f32.mrf.mxu3 }
 0xb17   : > { %v1709_v54 = vsel %vm920_vm11, %v1701_v53, -inf  ;;  %v1706_v29 = vmul.f32 0.35355338, %v1663_v25  ;;  %v2472_v25 = vld [vmem:[%s3506_s11 + $0x38] sm:$0xff] }
 0xb18   : > { %1710 = vmax.xlane.f32.xlu1 %v1709_v54 }
 0xb19   : > { %v1724_v54 = vsel %vm924_vm12, %v1706_v29, -inf }
 0xb1c   : > { %v1593_v22 = vpop.f32.mrf.mxu1 }
 0xb1d   : > { %v1702_v24 = vmul.f32 0.35355338, %v1593_v22 }
 0xb1f   : > { %v1712_v26 = vsel %vm924_vm12, %v1702_v24, -inf }
 0xb28   : > { %1871 = vrot.lane.b32.xlu0 %v1556_v31, %s3535_s1 }
 0xb31   : > { %1835 = vrot.lane.b32.xlu1 %v1552_v62, %s3535_s1 }
 0xb39   : > { %1905 = vrot.lane.b32.xlu1 %v1558_v36, %s3535_s1 }
 0xb41   : > { %1797 = vrot.lane.b32.xlu1 %v3260_v6, %s3535_s1 }
 0xb71   : > { %v1717_v57 = vpop.xlane.xlu1 %1716 }
 0xb72   : > { %v1735_v61 = vsub.f32 %v1703_v46, %v1717_v57  ;;  %v1698_v46 = vpop.f32.mrf.mxu0 }
 0xb73   : > { %v1708_v51 = vmul.f32 0.35355338, %v1698_v46 }
 0xb74   : > { %v1745_v1 = vmul.f32 1.442695, %v1735_v61  ;;  %v2462_v61 = vld [vmem:[%s3502_s7 + $0x28] sm:$0xff] }
 0xb85   : > { %v1723_v55 = vpop.xlane.xlu2 %1722 }
 0xb86   : > { %v1737_v56 = vsub.f32 %v1705_v48, %v1723_v55  ;;  %v1718_v55 = vsel %vm924_vm12, %v1704_v52, -inf }
 0xb87   : > { %v1729_v58 = vpop.xlane.xlu0 %1728 }
 0xb88   : > { %v1749_v59 = vmul.f32 1.442695, %v1737_v56  ;;  %v1739_v60 = vsub.f32 %v1707_v50, %v1729_v58 }
 0xb8a   : > { %2618 = vpow2.f32 %v1749_v59  ;;  %v1753_v63 = vmul.f32 1.442695, %v1739_v60  ;;  %v2464_v59 = vld [vmem:[%s3502_s7 + $0x38] sm:$0xff]  ;;  %v2463_v60 = vld [vmem:[%s3502_s7 + $0x30] sm:$0xff] }
 0xb8b   : > { %v1711_v13 = vpop.xlane.xlu1 %1710 }
 0xb8c   : > { %2620 = vpow2.f32 %v1753_v63  ;;  %v1733_v18 = vsub.f32 %v1701_v53, %v1711_v13  ;;  %v1730_v53 = vsel %vm924_vm12, %v1708_v51, -inf  ;;  %v2461_v63 = vld [vmem:[%s3502_s7 + $0x20] sm:$0xff] }
 0xb8d   : > { %2622 = vpow2.f32 %v1745_v1 }
 0xb8e   : > { %v1741_v19 = vmul.f32 1.442695, %v1733_v18 }
 0xb90   : > { %v2619_v2 = vpop.eup %2618  ;;  %2624 = vpow2.f32 %v1741_v19 }
 0xb91   : > { %v1769_v3 = vsel %vm920_vm11, %v2619_v2, 0.0 }
 0xb92   : > { %v2621_v4 = vpop.eup %2620  ;;  %1770 = vadd.xlane.f32.xlu0 %v1769_v3 }
 0xb93   : > { %v1775_v5 = vsel %vm920_vm11, %v2621_v4, 0.0  ;;  %v2623_v8 = vpop.eup %2622 }
 0xb94   : > { %1776 = vadd.xlane.f32.xlu2 %v1775_v5  ;;  %v1763_v14 = vsel %vm920_vm11, %v2623_v8, 0.0 }
 0xb96   : > { %v2625_v20 = vpop.eup %2624 }
 0xb97   : > { %v1757_v21 = vsel %vm920_vm11, %v2625_v20, 0.0 }
 0xb9a   : > { %v1872_v12 = vpop.permute.xlu0 %1871 }
 0xb9b   : > { %2455 = vmatpush.msk.msra.mxu3 %vm649_vm0, %v1872_v12 }
 0xb9c   : > { %1764 = vadd.xlane.f32.xlu2 %v1763_v14 }
 0xba3   : > { %v1836_v15 = vpop.permute.xlu1 %1835 }
 0xba4   : > { %2452 = vmatpush.msk.msra.mxu2 %vm649_vm0, %v1836_v15 }
 0xba6   : > { %1907 = vrot.lane.b32.xlu0 %v3288_v35, %s3535_s1 }
 0xbab   : > { %v1906_v0 = vpop.permute.xlu1 %1905 }
 0xbb3   : > { %v1798_v37 = vpop.permute.xlu1 %1797 }
 0xbb4   : > { %2548 = vrot.lane.b32.xlu2 %v2547_v16, %s3535_s1 }
 0xbbc   : > { %1799 = vrot.lane.b32.xlu2 %v3264_v10, %s3535_s1 }
 0xbd0   : > { %1758 = vadd.xlane.f32.xlu0 %v1757_v21 }
 0xbe5   : > { %1713 = vmax.xlane.f32.xlu2 %v1712_v26 }
 0xc05   : > { %v1771_v11 = vpop.xlane.xlu0 %1770 }
 0xc06   : > { %2626 = vrcp.f32 %v1771_v11 }
 0xc07   : > { %v1777_v27 = vpop.xlane.xlu2 %1776 }
 0xc0c   : > { %v2627_v30 = vpop.eup %2626 }
 0xc0d   : > { %v1793_v9 = vmul.f32 %v2627_v30, %v2619_v2 }
 0xc0f   : > { %v1765_v28 = vpop.xlane.xlu2 %1764 }
 0xc10   : > { %2628 = vrcp.f32 %v1765_v28 }
 0xc11   : > { %2630 = vrcp.f32 %v1777_v27 }
 0xc16   : > { %v2629_v7 = vpop.eup %2628 }
 0xc17   : > { %v2549_v6 = vpop.permute.xlu2 %2548  ;;  %v2631_v33 = vpop.eup %2630  ;;  %v1791_v31 = vmul.f32 %v2629_v7, %v2623_v8 }
 0xc18   : > { %v2551_v10 = vunpack.i.h.bf16 %v2549_v6  ;;  %v2550_v62 = vunpack.i.l.bf16 %v2549_v6  ;;  %v1908_v34 = vpop.permute.xlu0 %1907  ;;  %v1795_v35 = vmul.f32 %v2631_v33, %v2621_v4 }
 0xc19   : > { %2458 = vmatpush.msk.msrb.mxu0 %vm649_vm0, %v1908_v34 }
 0xc1a   : > { %1861 = vmatpush.msra.mxu2 %v2550_v62  ;;  %1897 = vmatpush.msra.mxu3 %v2551_v10 }
 0xc1b   : > { %2453 = vmatmul.msk.f32.vlgmr.msra.gmra.mxu2 %vm920_vm11, %v1791_v31  ;;  %2456 = vmatmul.msk.f32.vlgmr.msra.gmra.mxu3 %vm920_vm11, %v1793_v9 }
 0xc1c   : > { %1933 = vmatpush.msrb.mxu0 %v1906_v0  ;;  %v3377_v0 = vld [vmem:[%s3503_s8 + $0x1] ss:$0 sm:$0xff]  ;;  %2098 = vmatpush.msrb.mxu2 %v2472_v25 }
 0xc1d   : > { %2459 = vmatmul.msk.f32.vlgmr.msrb.gmra.mxu0 %vm920_vm11, %v1795_v35 }
 0xc1f   : > { %v1800_v36 = vpop.permute.xlu2 %1799 }
 0xc20   : > { %2449 = vmatpush.msk.msra.mxu1 %vm649_vm0, %v1800_v36 }
 0xc22   : > { %1825 = vmatpush.msra.mxu1 %v1798_v37 }
 0xc24   : > { %1999 = vmatpush.msrb.mxu1 %v2464_v59  ;;  %v3407_v59 = vld [vmem:[#allocation5 + $0x1] ss:$0 sm:$0xff] }
 0xc26   : > { %2000 = vmatpush.msrb.mxu1 %v2463_v60 }
 0xc28   : > { %2001 = vmatpush.msrb.mxu1 %v2462_v61 }
 0xc2a   : > { %2002 = vmatpush.msrb.mxu1 %v2461_v63  ;;  %v3412_v63 = vld [vmem:[%s3505_s10 + $0x1] ss:$0 sm:$0xff] }
 0xc43   : > { %v1759_v38 = vpop.xlane.xlu0 %1758 }
 0xc44   : > { %2632 = vrcp.f32 %v1759_v38 }
 0xc4a   : > { %v2633_v39 = vpop.eup %2632 }
 0xc4b   : > { %v1789_v40 = vmul.f32 %v2633_v39, %v2625_v20 }
 0xc4d   : > { %2450 = vmatmul.msk.f32.vlgmr.msra.gmra.mxu1 %vm920_vm11, %v1789_v40 }
 0xc58   : > { %v1714_v23 = vpop.xlane.xlu2 %1713 }
 0xc59   : > { %v1734_v42 = vsub.f32 %v1702_v24, %v1714_v23 }
 0xc5b   : > { %v1743_v43 = vmul.f32 1.442695, %v1734_v42 }
 0xc5d   : > { %2634 = vpow2.f32 %v1743_v43 }
 0xc63   : > { %v2635_v44 = vpop.eup %2634 }
 0xc64   : > { %v1760_v45 = vsel %vm924_vm12, %v2635_v44, 0.0 }
 0xc65   : > { %1761 = vadd.xlane.f32.xlu1 %v1760_v45 }
 0xc9a   : > { %v1935_v48 = vpop.f32.mrf.mxu0 }
 0xc9b   : > { %1959 = vrot.lane.b32.xlu1 %v1935_v48, %s2779_s24  ;;  %v2471_v48 = vld [vmem:[%s3506_s11 + $0x30] sm:$0xff] }
 0xc9c   : > { %2099 = vmatpush.msrb.mxu2 %v2471_v48 }
 0xc9e   : > { %v1863_v49 = vpop.f32.mrf.mxu2  ;;  %v1899_v50 = vpop.f32.mrf.mxu3 }
 0xc9f   : > { %1943 = vrot.lane.b32.xlu0 %v1863_v49, %s3536_s23  ;;  %1951 = vrot.lane.b32.xlu2 %v1899_v50, %s3537_s25  ;;  %v2470_v49 = vld [vmem:[%s3506_s11 + $0x28] sm:$0xff]  ;;  %v2469_v50 = vld [vmem:[%s3506_s11 + $0x20] sm:$0xff] }
 0xca0   : > { %2100 = vmatpush.msrb.mxu2 %v2470_v49 }
 0xca2   : > { %2101 = vmatpush.msrb.mxu2 %v2469_v50 }
 0xcc5   : > { %1731 = vmax.xlane.f32.xlu1 %v1730_v53 }
 0xcc8   : > { %1725 = vmax.xlane.f32.xlu2 %v1724_v54 }
 0xcc9   : > { %1719 = vmax.xlane.f32.xlu0 %v1718_v55 }
 0xcca   : > { %v1827_v1 = vpop.f32.mrf.mxu1 }
 0xcd8   : > { %v1762_v56 = vpop.xlane.xlu1 %1761 }
 0xcd9   : > { %2636 = vrcp.f32 %v1762_v56 }
 0xcdf   : > { %v2637_v57 = vpop.eup %2636 }
 0xce0   : > { %v1790_v58 = vmul.f32 %v2637_v57, %v2635_v44 }
 0xce2   : > { %2451 = vmatmul.msk.f32.gmra.mxu1 %vm920_vm11, %v1790_v58 }
 0xcf9   : > { %v1952_v3 = vpop.permute.xlu2 %1951 }
 0xd0d   : > { %v1960_v5 = vpop.permute.xlu1 %1959 }
 0xd11   : > { %v1944_v2 = vpop.permute.xlu0 %1943 }
 0xd12   : > { %v1965_v4 = vsel %vm775_vm10, %v1827_v1, %v1944_v2 }
 0xd13   : > { %v1967_v8 = vsel %vm1180_vm13, %v1965_v4, %v1952_v3 }
 0xd14   : > { %v1969_v12 = vsel %vm1183_vm14, %v1967_v8, %v1960_v5 }
 0xd15   : > { %2466 = vmatmul.msk.f32.vlgmr.msrb.gmra.mxu1 %vm657_vm1, %v1969_v12 }
 0xd38   : > { %v1732_v13 = vpop.xlane.xlu1 %1731 }
 0xd39   : > { %v1740_v14 = vsub.f32 %v1708_v51, %v1732_v13 }
 0xd3b   : > { %v1755_v15 = vmul.f32 1.442695, %v1740_v14  ;;  %v1726_v16 = vpop.xlane.xlu2 %1725  ;;  %v3425_v14 = vld [vmem:[%s3507_s12 + $0x1] ss:$0 sm:$0xff] }
 0xd3c   : > { %v1720_v18 = vpop.xlane.xlu0 %1719  ;;  %v1738_v20 = vsub.f32 %v1706_v29, %v1726_v16 }
 0xd3d   : > { %2638 = vpow2.f32 %v1755_v15  ;;  %v1736_v19 = vsub.f32 %v1704_v52, %v1720_v18 }
 0xd3e   : > { %v1751_v24 = vmul.f32 1.442695, %v1738_v20 }
 0xd3f   : > { %v1747_v21 = vmul.f32 1.442695, %v1736_v19 }
 0xd41   : > { %2640 = vpow2.f32 %v1747_v21  ;;  %v2485_v21 = vld [vmem:[%s3508_s13 + $0x78] sm:$0xff] }
 0xd42   : > { %2642 = vpow2.f32 %v1751_v24  ;;  %2225 = vmatpush.msrb.mxu3 %v2485_v21 }
 0xd43   : > { %v2639_v22 = vpop.eup %2638 }
 0xd44   : > { %v1778_v26 = vsel %vm924_vm12, %v2639_v22, 0.0 }
 0xd45   : > { %1779 = vadd.xlane.f32.xlu2 %v1778_v26  ;;  %v2484_v26 = vld [vmem:[%s3508_s13 + $0x70] sm:$0xff] }
 0xd46   : > { %2226 = vmatpush.msrb.mxu3 %v2484_v26 }
 0xd47   : > { %v2641_v27 = vpop.eup %2640 }
 0xd48   : > { %v1766_v11 = vsel %vm924_vm12, %v2641_v27, 0.0  ;;  %v2643_v28 = vpop.eup %2642 }
 0xd49   : > { %1767 = vadd.xlane.f32.xlu0 %v1766_v11  ;;  %v1772_v30 = vsel %vm924_vm12, %v2643_v28, 0.0 }
 0xd51   : > { %1773 = vadd.xlane.f32.xlu0 %v1772_v30 }
 0xd5f   : > { %v3372_v7 = vpop.f32.mrf.mxu1 }
 0xd92   : > { %v2004_v6 = vpop.f32.mrf.mxu1 }
 0xd93   : > { %v2005_v33 = vadd.f32 %v3377_v0, %v2004_v6  ;;  %v2482_v6 = vld [vmem:[%s3508_s13 + $0x60] sm:$0xff] }
 0xd95   : > { %v3381_v10 = vadd.f32 %v2005_v33, %v3220_v41 }
 0xd97   : > { %v2016_v62 = vsel %vm657_vm1, %v3381_v10, 0.0 }
 0xd98   : > { %2017 = vadd.xlane.f32.xlu1 %v2016_v62  ;;  %v2481_v62 = vld [vmem:[%s3508_s13 + $0x58] sm:$0xff] }
 0xdb8   : > { %v1780_v34 = vpop.xlane.xlu2 %1779 }
 0xdb9   : > { %2644 = vrcp.f32 %v1780_v34 }
 0xdbc   : > { %v1768_v9 = vpop.xlane.xlu0 %1767 }
 0xdbd   : > { %2646 = vrcp.f32 %v1768_v9 }
 0xdbf   : > { %v2645_v31 = vpop.eup %2644 }
 0xdc0   : > { %v1796_v35 = vmul.f32 %v2645_v31, %v2639_v22  ;;  %v2480_v31 = vld [vmem:[%s3508_s13 + $0x50] sm:$0xff] }
 0xdc2   : > { %2460 = vmatmul.msk.f32.gmra.mxu0 %vm920_vm11, %v1796_v35 }
 0xdc3   : > { %v2647_v36 = vpop.eup %2646 }
 0xdc4   : > { %v1774_v37 = vpop.xlane.xlu0 %1773  ;;  %v1792_v38 = vmul.f32 %v2647_v36, %v2641_v27  ;;  %v2479_v36 = vld [vmem:[%s3508_s13 + $0x48] sm:$0xff] }
 0xdc5   : > { %2648 = vrcp.f32 %v1774_v37 }
 0xdc6   : > { %2454 = vmatmul.msk.f32.gmra.mxu2 %vm920_vm11, %v1792_v38  ;;  %v2478_v38 = vld [vmem:[%s3508_s13 + $0x40] sm:$0xff] }
 0xdcb   : > { %v2649_v41 = vpop.eup %2648 }
 0xdcc   : > { %v1794_v39 = vmul.f32 %v2649_v41, %v2643_v28  ;;  %v2483_v28 = vld [vmem:[%s3508_s13 + $0x68] sm:$0xff] }
 0xdcd   : > { %2227 = vmatpush.msrb.mxu3 %v2483_v28 }
 0xdce   : > { %2457 = vmatmul.msk.f32.gmra.mxu3 %vm920_vm11, %v1794_v39 }
 0xdcf   : > { %2228 = vmatpush.msrb.mxu3 %v2482_v6 }
 0xdd1   : > { %2229 = vmatpush.msrb.mxu3 %v2481_v62 }
 0xdd3   : > { %2230 = vmatpush.msrb.mxu3 %v2480_v31 }
 0xdd5   : > { %2231 = vmatpush.msrb.mxu3 %v2479_v36  ;;  %v2269_v36 = vld [vmem:[%s3512_s17 + $0x18] sm:$0xff] }
 0xdd6   : > { %2286 = vmatpush.msra.mxu0 %v2269_v36 }
 0xdd7   : > { %2232 = vmatpush.msrb.mxu3 %v2478_v38 }
 0xe0b   : > { %v2018_v40 = vpop.xlane.xlu1 %2017 }
 0xe0c   : > { %v2022_v23 = vmul.f32 %v2018_v40, %v2954_v17 }
 0xe0e   : > { %v2024_v42 = vsub.f32 %v3381_v10, %v2022_v23 }
 0xe10   : > { %v2026_v43 = vmul.f32 %v2024_v42, %v2024_v42 }
 0xe12   : > { %v2028_v44 = vsel %vm657_vm1, %v2026_v43, 0.0 }
 0xe13   : > { %2029 = vadd.xlane.f32.xlu0 %v2028_v44 }
 0xe3f   : > { %v1938_v45 = vpop.f32.mrf.mxu0 }
 0xe40   : > { %1961 = vrot.lane.b32.xlu0 %v1938_v45, %s2779_s24 }
 0xe49   : > { %v1866_v46 = vpop.f32.mrf.mxu2 }
 0xe4a   : > { %1945 = vrot.lane.b32.xlu2 %v1866_v46, %s3536_s23 }
 0xe51   : > { %v1902_v47 = vpop.f32.mrf.mxu3 }
 0xe52   : > { %1953 = vrot.lane.b32.xlu1 %v1902_v47, %s3537_s25 }
 0xe86   : > { %v2030_v51 = vpop.xlane.xlu0 %2029 }
 0xe87   : > { %v2034_v29 = vmul.f32 %v2030_v51, %v2954_v17 }
 0xe89   : > { %v2036_v52 = vadd.f32 1e-05, %v2034_v29 }
 0xe8b   : > { %2650 = vrsqrt.f32 %v2036_v52  ;;  %vm2044_vm11 = vweird.f32 %v2036_v52 }
 0xe91   : > { %v2651_v53 = vpop.eup %2650 }
 0xe92   : > { %v2039_v54 = vmul.f32 %v2651_v53, %v2036_v52  ;;  %vm2045_vm0 = vweird.f32 %v2651_v53 }
 0xe93   : > { %vm2046_vm12 = vmor %vm2044_vm11, %vm2045_vm0 }
 0xe94   : > { %v2040_v55 = vmul.f32 %v2651_v53, %v2039_v54 }
 0xe96   : > { %v2041_v56 = vmul.f32 0.5, %v2040_v55 }
 0xe98   : > { %v2042_v57 = vsub.f32 1.5, %v2041_v56 }
 0xe9a   : > { %v2043_v58 = vmul.f32 %v2651_v53, %v2042_v57 }
 0xe9c   : > { %v2047_v60 = vsel %vm2046_vm12, %v2651_v53, %v2043_v58  ;;  %vm2294_vm12 = vcmask 0  }
 0xe9d   : > { %v2058_v61 = vmul.f32 %v2047_v60, %v2024_v42 }
 0xe9f   : > { %v2063_v1 = vmul.f32 %v3407_v59, %v2058_v61 }
 0xea1   : > { %v2068_v2 = vadd.f32 %v3412_v63, %v2063_v1 }
 0xea3   : > { %2474 = vmatmul.msk.f32.vlgmr.msrb.gmra.mxu2 %vm657_vm1, %v2068_v2 }
 0xea4   : > { %v1946_v3 = vpop.permute.xlu2 %1945 }
 0xea5   : > { %v1966_v4 = vsel %vm775_vm10, %v3372_v7, %v1946_v3 }
 0xeb2   : > { %v1962_v8 = vpop.permute.xlu0 %1961 }
 0xec4   : > { %v1954_v5 = vpop.permute.xlu1 %1953 }
 0xec5   : > { %v1968_v12 = vsel %vm1180_vm13, %v1966_v4, %v1954_v5 }
 0xec6   : > { %v1970_v13 = vsel %vm1183_vm14, %v1968_v12, %v1962_v8 }
 0xec7   : > { %2467 = vmatmul.msk.f32.gmra.mxu1 %vm657_vm1, %v1970_v13  ;;  %v2567_v13 = vld [vmem:[%s3509_s14 + $0x1] ss:$0 sm:$0xff] }
 0xf26   : > { %v2103_v15 = vpop.f32.mrf.mxu2 }
 0xf27   : > { %v2104_v16 = vadd.f32 %v3425_v14, %v2103_v15 }
 0xf29   : > { %v2111_v18 = vmul.f32 0.70710677, %v2104_v16  ;;  %v2109_v61 = vmul.f32 0.5, %v2104_v16 }
 0xf2b   : > { %v2113_v19 = vmul.f32 %v2111_v18, %v2111_v18 }
 0xf2d   : > { %v2114_v20 = vmin.f32 %v2113_v19, 16.0 }
 0xf2f   : > { %v2115_v22 = vmul.f32 2.1237322e-06, %v2114_v20  ;;  %v2126_v24 = vmul.f32 3.8918573e-05, %v2114_v20 }
 0xf31   : > { %v2116_v27 = vadd.f32 0.00028619796, %v2115_v22  ;;  %v2127_v11 = vadd.f32 0.001143296, %v2126_v24 }
 0xf33   : > { %v2117_v30 = vmul.f32 %v2116_v27, %v2114_v20  ;;  %v2128_v7 = vmul.f32 %v2127_v11, %v2114_v20 }
 0xf35   : > { %v2129_v33 = vadd.f32 0.014752088, %v2128_v7  ;;  %v2118_v34 = vadd.f32 0.0036580483, %v2117_v30 }
 0xf37   : > { %v2130_v9 = vmul.f32 %v2129_v33, %v2114_v20  ;;  %v2119_v37 = vmul.f32 %v2118_v34, %v2114_v20 }
 0xf39   : > { %v2131_v35 = vadd.f32 0.112945676, %v2130_v9  ;;  %v2120_v40 = vadd.f32 0.05243302, %v2119_v37  ;;  %v2266_v37 = vld [vmem:[%s3512_s17] sm:$0xff] }
 0xf3b   : > { %v2132_v41 = vmul.f32 %v2131_v35, %v2114_v20  ;;  %v2121_v43 = vmul.f32 %v2120_v40, %v2114_v20 }
 0xf3d   : > { %v2133_v39 = vadd.f32 0.4994258, %v2132_v41  ;;  %v2122_v46 = vadd.f32 0.18741608, %v2121_v43 }
 0xf3f   : > { %v2134_v23 = vmul.f32 %v2133_v39, %v2114_v20  ;;  %v2123_v49 = vmul.f32 %v2122_v46, %v2114_v20 }
 0xf41   : > { %v2135_v42 = vadd.f32 1.0, %v2134_v23  ;;  %v2124_v52 = vadd.f32 1.1283791, %v2123_v49 }
 0xf43   : > { %2652 = vrcp.f32 %v2135_v42  ;;  %v2147_v29 = vand.u32 2147483648, %v2135_v42  ;;  %v2145_v54 = vand.u32 2147483647, %v2135_v42  ;;  %vm2141_vm13 = vweird.f32 %v2135_v42 }
 0xf44   : > { %v2007_v44 = vpop.f32.mrf.mxu1 }
 0xf45   : > { %v2008_v45 = vadd.f32 %v3377_v0, %v2007_v44  ;;  %v2148_v56 = vor.u32 1.1754944e-38, %v2147_v29  ;;  %v2125_v0 = vmul.f32 %v2124_v52, %v2111_v18  ;;  %vm2146_vm8 = vcmp.eq.f32.partialorder %v2145_v54, 8.507059e+37 }
 0xf47   : > { %v2011_v47 = vadd.f32 %v2008_v45, %v3225_v32 }
 0xf49   : > { %v2653_v25 = vpop.eup %2652  ;;  %v2019_v48 = vsel %vm661_vm2, %v2011_v47, 0.0 }
 0xf4a   : > { %v2137_v50 = vmul.f32 %v2653_v25, %v2135_v42  ;;  %2020 = vadd.xlane.f32.xlu2 %v2019_v48  ;;  %vm2142_vm10 = vweird.f32 %v2653_v25 }
 0xf4b   : > { %vm2143_vm14 = vmor %vm2141_vm13, %vm2142_vm10 }
 0xf4c   : > { %v2138_v51 = vsub.f32 1.0, %v2137_v50 }
 0xf4e   : > { %v2139_v53 = vmul.f32 %v2653_v25, %v2138_v51 }
 0xf50   : > { %v2140_v55 = vadd.f32 %v2653_v25, %v2139_v53 }
 0xf52   : > { %v2144_v57 = vsel %vm2143_vm14, %v2653_v25, %v2140_v55  ;;  %v2240_v55 = vld [vmem:[#allocation7] sm:$0x1] }
 0xf53   : > { %v2149_v32 = vsel %vm2146_vm8, %v2148_v56, %v2144_v57 }
 0xf54   : > { %v2150_v58 = vmul.f32 %v2149_v32, %v2125_v0 }
 0xf56   : > { %v2476_v60 = vclamps-f32 %v2150_v58, 1.0  ;;  %v2241_v58 = vld [vmem:[%s3511_s16] sm:$0x1] }
 0xf58   : > { %v2193_v1 = vadd.f32 1.0, %v2476_v60 }
 0xf5a   : > { %v2195_v2 = vmul.f32 %v2193_v1, %v2109_v61 }
 0xf5c   : > { %2487 = vmatmul.msk.f32.vlgmr.msrb.gmra.mxu3 %vm1418_vm4, %v2195_v2 }
 0xfbd   : > { %v2021_v3 = vpop.xlane.xlu2 %2020 }
 0xfbe   : > { %v2023_v4 = vmul.f32 %v2021_v3, %v2954_v17 }
 0xfc0   : > { %v2025_v5 = vsub.f32 %v2011_v47, %v2023_v4 }
 0xfc2   : > { %v2027_v8 = vmul.f32 %v2025_v5, %v2025_v5 }
 0xfc4   : > { %v2031_v12 = vsel %vm661_vm2, %v2027_v8, 0.0 }
 0xfc5   : > { %2032 = vadd.xlane.f32.xlu0 %v2031_v12 }
 0xfdf   : > { %v2234_v15 = vpop.f32.mrf.mxu3 }
 0xfe0   : > { %v2235_v18 = vadd.f32 %v2567_v13, %v2234_v15 }
 0xfe2   : > { %v2239_v16 = vadd.f32 %v2235_v18, %v3381_v10 }
 0xfe4   : > { %v2242_v19 = vsel %vm661_vm2, %v2239_v16, 0.0 }
 0xfe5   : > { %2243 = vadd.xlane.f32.xlu1 %v2242_v19 }
0x1038   : > { %v2033_v20 = vpop.xlane.xlu0 %2032 }
0x1039   : > { %v2035_v21 = vmul.f32 %v2033_v20, %v2954_v17 }
0x103b   : > { %v2037_v22 = vadd.f32 1e-05, %v2035_v21 }
0x103d   : > { %2654 = vrsqrt.f32 %v2037_v22  ;;  %vm2054_vm15 = vweird.f32 %v2037_v22 }
0x1043   : > { %v2655_v24 = vpop.eup %2654 }
0x1044   : > { %v2049_v26 = vmul.f32 %v2655_v24, %v2037_v22  ;;  %vm2055_vm9 = vweird.f32 %v2655_v24 }
0x1045   : > { %vm2056_vm3 = vmor %vm2054_vm15, %vm2055_vm9 }
0x1046   : > { %v2050_v27 = vmul.f32 %v2655_v24, %v2049_v26 }
0x1048   : > { %v2051_v11 = vmul.f32 0.5, %v2050_v27 }
0x104a   : > { %v2052_v28 = vsub.f32 1.5, %v2051_v11 }
0x104c   : > { %v2053_v30 = vmul.f32 %v2655_v24, %v2052_v28 }
0x104e   : > { %v2057_v7 = vsel %vm2056_vm3, %v2655_v24, %v2053_v30 }
0x104f   : > { %v2059_v6 = vmul.f32 %v2057_v7, %v2025_v5 }
0x1051   : > { %v2064_v10 = vmul.f32 %v3407_v59, %v2059_v6  ;;  %v2268_v59 = vld [vmem:[%s3512_s17 + $0x10] sm:$0xff] }
0x1052   : > { %2287 = vmatpush.msra.mxu0 %v2268_v59 }
0x1053   : > { %v2069_v33 = vadd.f32 %v3412_v63, %v2064_v10  ;;  %v2267_v63 = vld [vmem:[%s3512_s17 + $0x8] sm:$0xff] }
0x1054   : > { %2288 = vmatpush.msra.mxu0 %v2267_v63 }
0x1055   : > { %2475 = vmatmul.msk.f32.gmra.mxu2 %vm657_vm1, %v2069_v33 }
0x1056   : > { %2289 = vmatpush.msra.mxu0 %v2266_v37 }
0x1058   : > { %v2244_v62 = vpop.xlane.xlu1 %2243 }
0x1059   : > { %v2245_v34 = vmul.f32 %v2244_v62, %v2954_v17 }
0x105b   : > { %v2246_v9 = vsub.f32 %v2239_v16, %v2245_v34  ;;  %v2270_v34 = vld [vmem:[#allocation2] sm:$0x1] }
0x105d   : > { %v2247_v31 = vmul.f32 %v2246_v9, %v2246_v9 }
0x105f   : > { %v2248_v35 = vsel %vm661_vm2, %v2247_v31, 0.0 }
0x1060   : > { %2249 = vadd.xlane.f32.xlu2 %v2248_v35 }
0x10d3   : > { %v2250_v38 = vpop.xlane.xlu2 %2249 }
0x10d4   : > { %v2251_v41 = vmul.f32 %v2250_v38, %v2954_v17 }
0x10d6   : > { %v2252_v39 = vadd.f32 1e-05, %v2251_v41 }
0x10d8   : > { %2656 = vrsqrt.f32 %v2252_v39  ;;  %v2106_v40 = vpop.f32.mrf.mxu2  ;;  %vm2259_vm5 = vweird.f32 %v2252_v39 }
0x10d9   : > { %v2107_v23 = vadd.f32 %v3425_v14, %v2106_v40 }
0x10db   : > { %v2112_v42 = vmul.f32 0.70710677, %v2107_v23  ;;  %v2110_v10 = vmul.f32 0.5, %v2107_v23 }
0x10dd   : > { %v2153_v43 = vmul.f32 %v2112_v42, %v2112_v42 }
0x10de   : > { %v2657_v44 = vpop.eup %2656 }
0x10df   : > { %v2254_v45 = vmul.f32 %v2657_v44, %v2252_v39  ;;  %v2154_v46 = vmin.f32 %v2153_v43, 16.0  ;;  %vm2260_vm2 = vweird.f32 %v2657_v44 }
0x10e0   : > { %vm2261_vm6 = vmor %vm2259_vm5, %vm2260_vm2 }
0x10e1   : > { %v2255_v47 = vmul.f32 %v2657_v44, %v2254_v45  ;;  %v2155_v25 = vmul.f32 2.1237322e-06, %v2154_v46  ;;  %v2166_v48 = vmul.f32 3.8918573e-05, %v2154_v46 }
0x10e3   : > { %v2256_v49 = vmul.f32 0.5, %v2255_v47  ;;  %v2156_v50 = vadd.f32 0.00028619796, %v2155_v25  ;;  %v2167_v51 = vadd.f32 0.001143296, %v2166_v48 }
0x10e5   : > { %v2257_v29 = vsub.f32 1.5, %v2256_v49  ;;  %v2157_v52 = vmul.f32 %v2156_v50, %v2154_v46  ;;  %v2168_v17 = vmul.f32 %v2167_v51, %v2154_v46 }
0x10e7   : > { %v2258_v53 = vmul.f32 %v2657_v44, %v2257_v29  ;;  %v2169_v54 = vadd.f32 0.014752088, %v2168_v17  ;;  %v2158_v14 = vadd.f32 0.0036580483, %v2157_v52 }
0x10e9   : > { %v2262_v56 = vsel %vm2261_vm6, %v2657_v44, %v2258_v53  ;;  %v2170_v0 = vmul.f32 %v2169_v54, %v2154_v46  ;;  %v2159_v61 = vmul.f32 %v2158_v14, %v2154_v46 }
0x10ea   : > { %v2263_v57 = vmul.f32 %v2262_v56, %v2246_v9 }
0x10eb   : > { %v2171_v32 = vadd.f32 0.112945676, %v2170_v0  ;;  %v2160_v4 = vadd.f32 0.05243302, %v2159_v61 }
0x10ec   : > { %v2264_v60 = vmul.f32 %v2263_v57, %v2240_v55 }
0x10ed   : > { %v2172_v1 = vmul.f32 %v2171_v32, %v2154_v46  ;;  %v2161_v12 = vmul.f32 %v2160_v4, %v2154_v46 }
0x10ee   : > { %v2265_v2 = vadd.f32 %v2264_v60, %v2241_v58 }
0x10ef   : > { %v2173_v3 = vadd.f32 0.4994258, %v2172_v1  ;;  %v2162_v13 = vadd.f32 0.18741608, %v2161_v12 }
0x10f0   : > { %2489 = vmatmul.msk.f32.vlgmr.msra.gmra.mxu0 %vm657_vm1, %v2265_v2 }
0x10f1   : > { %v2174_v5 = vmul.f32 %v2173_v3, %v2154_v46  ;;  %v2163_v18 = vmul.f32 %v2162_v13, %v2154_v46 }
0x10f3   : > { %v2175_v8 = vadd.f32 1.0, %v2174_v5  ;;  %v2164_v21 = vadd.f32 1.1283791, %v2163_v18 }
0x10f5   : > { %2658 = vrcp.f32 %v2175_v8  ;;  %v2187_v20 = vand.u32 2147483648, %v2175_v8  ;;  %v2185_v24 = vand.u32 2147483647, %v2175_v8  ;;  %vm2181_vm0 = vweird.f32 %v2175_v8 }
0x10f6   : > { %v2165_v11 = vmul.f32 %v2164_v21, %v2112_v42 }
0x10f7   : > { %v2188_v27 = vor.u32 1.1754944e-38, %v2187_v20  ;;  %vm2186_vm1 = vcmp.eq.f32.partialorder %v2185_v24, 8.507059e+37 }
0x10fb   : > { %v2659_v15 = vpop.eup %2658 }
0x10fc   : > { %v2177_v16 = vmul.f32 %v2659_v15, %v2175_v8  ;;  %vm2182_vm7 = vweird.f32 %v2659_v15 }
0x10fd   : > { %vm2183_vm11 = vmor %vm2181_vm0, %vm2182_vm7 }
0x10fe   : > { %v2178_v19 = vsub.f32 1.0, %v2177_v16 }
0x1100   : > { %v2179_v22 = vmul.f32 %v2659_v15, %v2178_v19 }
0x1102   : > { %v2180_v26 = vadd.f32 %v2659_v15, %v2179_v22 }
0x1104   : > { %v2184_v28 = vsel %vm2183_vm11, %v2659_v15, %v2180_v26 }
0x1105   : > { %v2189_v30 = vsel %vm2186_vm1, %v2188_v27, %v2184_v28 }
0x1106   : > { %v2190_v7 = vmul.f32 %v2189_v30, %v2165_v11 }
0x1108   : > { %v2477_v6 = vclamps-f32 %v2190_v7, 1.0 }
0x110a   : > { %v2194_v33 = vadd.f32 1.0, %v2477_v6 }
0x110c   : > { %v2196_v62 = vmul.f32 %v2194_v33, %v2110_v10 }
0x110e   : > { %2488 = vmatmul.msk.f32.gmra.mxu3 %vm1418_vm4, %v2196_v62 }
0x116d   : > { %v2291_v9 = vpop.f32.mrf.mxu0 }
0x116e   : > { %v2292_v31 = vadd.f32 %v2291_v9, %v2270_v34 }
0x1170   : > { %2295 = vst.msk [vmem:[%s643_s9] sm:$0x1] %vm2294_vm12, %v2292_v31 }
0x1191   : > { %v2237_v35 = vpop.f32.mrf.mxu3 }
0x1192 PF: > { %s33_s20 = sadd.s32 1, %s2764_s20  }
0x1193   : > { %p30_p7 = scmp.ge.s32.totalorder %s33_s20, 4  }
0x1195   :  { %32 = sbr.rel (!%p30_p7) target bundleno = 8 (0x8), region = 151 }
0x119a   :  { %2313 = vsyncpa [#allocation4], 1 }
0x119b   :  { %2315 = vsyncpa [#allocation4 + $0x1], 1 }
0x119c   :  { %2316 = vsyncpa [#allocation6], 1 }

</bundles_post_ra>
